<compile_context>
chip_gen: v7x
topology: tpu7x:2x2x1
jax: 0.10.0
libtpu: 0.0.40
codegen_flags: <defaults>
</compile_context>

<pallas_src>
import functools
import math

import jax
import jax.numpy as jnp
from jax.experimental import pallas as pl
from jax.experimental.pallas import tpu as pltpu


# ---------------------------------------------------------------------------
# hardware hints & small helpers
# ---------------------------------------------------------------------------
def _detect_vmem_cap():
    try:
        return int(pltpu.get_tpu_info().vmem_capacity_bytes)
    except Exception:
        return 64 << 20          # conservative (v7x per-core VMEM)


def _detect_v5e():
    try:
        kind = jax.devices()[0].device_kind.lower()
        return ("v5 lite" in kind) or ("v5e" in kind) or ("v5litepod" in kind)
    except Exception:
        return False


_VMEM_CAP = _detect_vmem_cap()
_IS_V5E = _detect_v5e()
_ROW_TILE_PREF = 128 if _IS_V5E else 256        # v5e MXU is 4x128^2; v6e/v7x 2x256^2


def _layer_norm(x, g, b, eps=1e-5):
    # x: (rows, D) f32; g, b: (1, D) f32
    mu = jnp.mean(x, axis=-1, keepdims=True)
    var = jnp.mean((x - mu) ** 2, axis=-1, keepdims=True)
    return (x - mu) * jax.lax.rsqrt(var + eps) * g + b


def _supports_single_buffering():
    """Probe whether this build accepts pipeline_mode=pl.Buffered(1) for constant operands."""
    def _probe(x_ref, o_ref):
        o_ref[...] = x_ref[...]
    try:
        spec = pl.BlockSpec((8, 128), lambda i: (0, 0), pipeline_mode=pl.Buffered(1))
        out = pl.pallas_call(
            _probe,
            out_shape=jax.ShapeDtypeStruct((8, 128), jnp.float32),
            grid=(1,),
            in_specs=[spec],
            out_specs=pl.BlockSpec((8, 128), lambda i: (0, 0)),
        )(jnp.zeros((8, 128), jnp.float32))
        jax.block_until_ready(out)
        return True
    except Exception:
        return False


_SINGLE_BUFFER_CONSTS = _supports_single_buffering()
_CONST_BUFS = 1 if _SINGLE_BUFFER_CONSTS else 2     # used for honest VMEM accounting


def _const_spec(shape):
    """Whole-array block with a constant block index (weights/biases). Single-buffered when
    supported; there is no point double-buffering a block that never changes."""
    zeros = (0,) * len(shape)
    if _SINGLE_BUFFER_CONSTS:
        return pl.BlockSpec(shape, lambda *_: zeros, pipeline_mode=pl.Buffered(1))
    return pl.BlockSpec(shape, lambda *_: zeros)


def _vmem_limit(entries, headroom=8 << 20):
    """Scoped-VMEM budget from the actual block/scratch footprint, capped below capacity."""
    total = headroom
    for shape, dtype, nbufs in entries:
        total += math.prod(shape) * jnp.dtype(dtype).itemsize * nbufs
    cap = int(0.85 * _VMEM_CAP)
    return int(max(min(total, cap), min(32 << 20, cap)))


def _pick_tile(n, pref):
    """Largest 'nice' tile <= pref that divides n (else the full extent n)."""
    for t in (512, 256, 128, 64, 32, 16, 8):
        if t <= pref and n % t == 0:
            return t
    return n


def _pick_head_group(num_heads, head_dim):
    """Largest G dividing H with a lane-dense group width (G*hd multiple of 128, <= 512)."""
    for g in range(num_heads, 0, -1):
        if num_heads % g == 0 and (g * head_dim) % 128 == 0 and g * head_dim <= 512:
            return g
    for g in range(num_heads, 0, -1):
        if num_heads % g == 0 and (g * head_dim) % 128 == 0:
            return g
    raise ValueError("head_dim * head_group must be a multiple of 128 lanes")


# ---------------------------------------------------------------------------
# Kernel 1: LayerNorm + fused QKV projection over flattened rows (B*S, D) -> (B*S, 3D).
# ---------------------------------------------------------------------------
def ln_qkv_kernel(x_ref, g_ref, b_ref, wqkv_ref, bqkv_ref, o_ref):
    xn = _layer_norm(x_ref[...].astype(jnp.float32), g_ref[...], b_ref[...])
    qkv = jnp.dot(xn.astype(wqkv_ref.dtype), wqkv_ref[...],
                  preferred_element_type=jnp.float32) + bqkv_ref[...]
    o_ref[...] = qkv.astype(o_ref.dtype)


def run_ln_qkv(x2d, lp, *, tr):
    R, D = x2d.shape
    D3 = lp['wqkv'].shape[1]
    limit = _vmem_limit([
        ((tr, D), jnp.bfloat16, 2), ((tr, D3), jnp.bfloat16, 2),
        ((1, D), jnp.float32, 2 * _CONST_BUFS),
        ((D, D3), jnp.bfloat16, _CONST_BUFS), ((1, D3), jnp.float32, _CONST_BUFS),
        ((tr, D3), jnp.float32, 1),                      # f32 accumulation temporary
    ])
    return pl.pallas_call(
        ln_qkv_kernel,
        out_shape=jax.ShapeDtypeStruct((R, D3), jnp.bfloat16),
        grid=(R // tr,),
        in_specs=[
            pl.BlockSpec((tr, D), lambda r: (r, 0)),
            _const_spec((1, D)), _const_spec((1, D)),        # ln1 gamma / beta
            _const_spec((D, D3)), _const_spec((1, D3)),      # fused Wqkv (scale folded), bqkv
        ],
        out_specs=pl.BlockSpec((tr, D3), lambda r: (r, 0)),
        compiler_params=pltpu.CompilerParams(
            dimension_semantics=("parallel",), vmem_limit_bytes=limit),
    )(x2d, lp['ln1_g'], lp['ln1_b'], lp['wqkv'], lp['bqkv'])


# ---------------------------------------------------------------------------
# Kernel 2: attention. Grid (B, head_groups, Q-tiles). Q/K/V are lane slices of the fused
# (B,S,3D) qkv tensor (group width G*hd is a multiple of 128). The whole K/V extent for the
# group sits in VMEM, so the softmax is computed in one shot (no online-softmax carry, no
# per-K-tile grid overhead). ctx is written lane-dense straight into (B,S,D) layout.
# ---------------------------------------------------------------------------
def flash_attn_kernel(q_ref, k_ref, v_ref, o_ref, *, heads, head_dim):
    q = q_ref[0]          # (tq, G*hd) bf16  (1/sqrt(hd) already folded into Wq)
    k = k_ref[0]          # (S,  G*hd) bf16
    v = v_ref[0]          # (S,  G*hd) bf16
    outs = []
    for h in range(heads):                                  # small unrolled group loop
        lo = h * head_dim
        hi = lo + head_dim
        q_h = q[:, lo:hi]
        k_h = k[:, lo:hi]
        v_h = v[:, lo:hi]
        s = jax.lax.dot_general(q_h, k_h, (((1,), (1,)), ((), ())),
                                preferred_element_type=jnp.float32)        # (tq, S) f32
        # TODO(synk): ESM applies a padding-key mask here; omitted (no pad tokens in batch).
        m = jnp.max(s, axis=-1, keepdims=True)
        p = jnp.exp(s - m)
        l = jnp.sum(p, axis=-1, keepdims=True)
        ctx = jnp.dot(p.astype(v_h.dtype), v_h, preferred_element_type=jnp.float32)
        outs.append(ctx * pl.reciprocal(l, approx=True))    # EUP reciprocal on (tq, hd)
    o_ref[0] = jnp.concatenate(outs, axis=-1).astype(o_ref.dtype)          # one lane-dense store


def run_flash_attention(qkv, *, num_heads, head_dim, tq):
    B, S, D3 = qkv.shape
    D = num_heads * head_dim
    G = _pick_head_group(num_heads, head_dim)
    gw = G * head_dim
    n_groups = num_heads // G
    kernel = functools.partial(flash_attn_kernel, heads=G, head_dim=head_dim)
    limit = _vmem_limit([
        ((1, tq, gw), jnp.bfloat16, 2),
        ((1, S, gw), jnp.bfloat16, 4),                      # K and V blocks (double-buffered)
        ((1, tq, gw), jnp.bfloat16, 2),                     # ctx output block
        ((tq, S), jnp.float32, 2 + G),                      # score/prob temporaries
        ((tq, gw), jnp.float32, 2),
    ])
    return pl.pallas_call(
        kernel,
        out_shape=jax.ShapeDtypeStruct((B, S, D), jnp.bfloat16),
        grid=(B, n_groups, S // tq),
        in_specs=[
            # qkv layout along lanes: [ Q groups | K groups | V groups ], each group gw wide.
            pl.BlockSpec((1, tq, gw), lambda b, g, qi: (b, qi, g)),
            pl.BlockSpec((1, S, gw), lambda b, g, qi: (b, 0, n_groups + g)),
            pl.BlockSpec((1, S, gw), lambda b, g, qi: (b, 0, 2 * n_groups + g)),
        ],
        out_specs=pl.BlockSpec((1, tq, gw), lambda b, g, qi: (b, qi, g)),
        compiler_params=pltpu.CompilerParams(
            dimension_semantics=("parallel", "parallel", "parallel"),
            vmem_limit_bytes=limit),
    )(qkv, qkv, qkv)


# ---------------------------------------------------------------------------
# Kernel 3: out-projection + residual + LN2 + GELU FFN over flattened rows.
# Primary path keeps Wo/W1/W2 resident in VMEM (one grid axis over row tiles); an F-tiled
# reduction fallback is used when the resident footprint does not fit the VMEM budget
# (e.g. ESM-3B scale on v7x's 64 MiB).
# ---------------------------------------------------------------------------
def attn_out_ffn_resident_kernel(x_ref, ctx_ref, wo_ref, bo_ref, g2_ref, b2n_ref,
                                 w1_ref, b1_ref, w2_ref, b2_ref, o_ref):
    attn = jnp.dot(ctx_ref[...], wo_ref[...], preferred_element_type=jnp.float32) + bo_ref[...]
    x1 = x_ref[...].astype(jnp.float32) + attn
    xn = _layer_norm(x1, g2_ref[...], b2n_ref[...]).astype(w1_ref.dtype)
    h = jnp.dot(xn, w1_ref[...], preferred_element_type=jnp.float32) + b1_ref[...]
    h = jax.nn.gelu(h, approximate=True)
    ff = jnp.dot(h.astype(w2_ref.dtype), w2_ref[...], preferred_element_type=jnp.float32) + b2_ref[...]
    o_ref[...] = (x1 + ff).astype(o_ref.dtype)


def attn_out_ffn_ftiled_kernel(x_ref, ctx_ref, wo_ref, bo_ref, g2_ref, b2n_ref,
                               w1_ref, b1_ref, w2_ref, b2_ref, o_ref,
                               x1_sc, xn2_sc, ff_sc):
    f = pl.program_id(1)

    @pl.when(f == 0)
    def _head():
        attn = jnp.dot(ctx_ref[...], wo_ref[...],
                       preferred_element_type=jnp.float32) + bo_ref[...]
        x1 = x_ref[...].astype(jnp.float32) + attn
        x1_sc[...] = x1
        xn2_sc[...] = _layer_norm(x1, g2_ref[...], b2n_ref[...]).astype(xn2_sc.dtype)
        ff_sc[...] = jnp.zeros(ff_sc.shape, dtype=ff_sc.dtype)

    h = jnp.dot(xn2_sc[...], w1_ref[...], preferred_element_type=jnp.float32) + b1_ref[...]
    h = jax.nn.gelu(h, approximate=True)
    ff_sc[...] += jnp.dot(h.astype(w2_ref.dtype), w2_ref[...],
                          preferred_element_type=jnp.float32)

    @pl.when(f == pl.num_programs(1) - 1)
    def _tail():
        o_ref[...] = (x1_sc[...] + ff_sc[...] + b2_ref[...]).astype(o_ref.dtype)


def _resident_ffn_fits(D, F, tr):
    w = (D * D + 2 * D * F) * 2 * _CONST_BUFS            # Wo, W1, W2 bf16 const blocks
    p = (5 * D + F) * 4 * _CONST_BUFS                    # biases + LN params f32
    a = 3 * 2 * tr * D * 2                               # x / ctx / out row tiles, double-buffered
    i = tr * F * 4 * 2 + tr * D * 4 * 3                  # f32 temporaries (h, x1, ff)
    total = w + p + a + i + (8 << 20)
    return total <= int(0.78 * _VMEM_CAP), total


def run_attn_out_ffn(x2d, ctx2d, lp, *, tr, force_tiled=False, tf=None):
    R, D = x2d.shape
    F = lp['w1'].shape[1]
    fits, resident_bytes = _resident_ffn_fits(D, F, tr)

    if fits and not force_tiled:
        limit = _vmem_limit([
            ((tr, D), jnp.bfloat16, 6),
            ((D, D), jnp.bfloat16, _CONST_BUFS),
            ((D, F), jnp.bfloat16, _CONST_BUFS), ((F, D), jnp.bfloat16, _CONST_BUFS),
            ((1, D), jnp.float32, 5 * _CONST_BUFS), ((1, F), jnp.float32, _CONST_BUFS),
            ((tr, F), jnp.float32, 2), ((tr, D), jnp.float32, 3),
        ])
        return pl.pallas_call(
            attn_out_ffn_resident_kernel,
            out_shape=jax.ShapeDtypeStruct((R, D), jnp.bfloat16),
            grid=(R // tr,),
            in_specs=[
                pl.BlockSpec((tr, D), lambda r: (r, 0)),     # residual stream
                pl.BlockSpec((tr, D), lambda r: (r, 0)),     # ctx (heads already merged)
                _const_spec((D, D)), _const_spec((1, D)),    # Wo, bo
                _const_spec((1, D)), _const_spec((1, D)),    # ln2 gamma / beta
                _const_spec((D, F)), _const_spec((1, F)),    # W1, b1 (resident)
                _const_spec((F, D)), _const_spec((1, D)),    # W2, b2 (resident)
            ],
            out_specs=pl.BlockSpec((tr, D), lambda r: (r, 0)),
            compiler_params=pltpu.CompilerParams(
                dimension_semantics=("parallel",), vmem_limit_bytes=limit),
        )(x2d, ctx2d, lp['wo'], lp['bo'], lp['ln2_g'], lp['ln2_b'],
          lp['w1'], lp['b1'], lp['w2'], lp['b2'])

    # F-tiled fallback (large models on tight VMEM): F is a reduction grid axis.
    if tf is None:
        tf = _pick_tile(F, 1024)
    limit = _vmem_limit([
        ((tr, D), jnp.bfloat16, 6),
        ((D, D), jnp.bfloat16, _CONST_BUFS), ((1, D), jnp.float32, 5 * _CONST_BUFS),
        ((D, tf), jnp.bfloat16, 2), ((1, tf), jnp.float32, 2), ((tf, D), jnp.bfloat16, 2),
        ((tr, D), jnp.float32, 2), ((tr, D), jnp.bfloat16, 1), ((tr, tf), jnp.float32, 2),
    ])
    return pl.pallas_call(
        attn_out_ffn_ftiled_kernel,
        out_shape=jax.ShapeDtypeStruct((R, D), jnp.bfloat16),
        grid=(R // tr, F // tf),
        in_specs=[
            pl.BlockSpec((tr, D), lambda r, f: (r, 0)),
            pl.BlockSpec((tr, D), lambda r, f: (r, 0)),
            _const_spec((D, D)), _const_spec((1, D)),
            _const_spec((1, D)), _const_spec((1, D)),
            pl.BlockSpec((D, tf), lambda r, f: (0, f)),      # W1 tile streams over F
            pl.BlockSpec((1, tf), lambda r, f: (0, f)),      # b1 tile
            pl.BlockSpec((tf, D), lambda r, f: (f, 0)),      # W2 tile
            _const_spec((1, D)),                             # b2
        ],
        out_specs=pl.BlockSpec((tr, D), lambda r, f: (r, 0)),
        scratch_shapes=[
            pltpu.VMEM((tr, D), jnp.float32),    # x + attn (residual)
            pltpu.VMEM((tr, D), jnp.bfloat16),   # LN2 output (FFN input)
            pltpu.VMEM((tr, D), jnp.float32),    # FFN accumulator
        ],
        compiler_params=pltpu.CompilerParams(
            dimension_semantics=("parallel", "arbitrary"), vmem_limit_bytes=limit),
    )(x2d, ctx2d, lp['wo'], lp['bo'], lp['ln2_g'], lp['ln2_b'],
      lp['w1'], lp['b1'], lp['w2'], lp['b2'])


# ---------------------------------------------------------------------------
# Kernel 4: final LayerNorm of the gathered (B, D) CLS rows only.
# ---------------------------------------------------------------------------
def cls_ln_kernel(x_ref, g_ref, b_ref, o_ref):
    o_ref[...] = _layer_norm(x_ref[...].astype(jnp.float32),
                             g_ref[...], b_ref[...]).astype(o_ref.dtype)


def run_cls_ln(cls_rows, g, b):
    B, D = cls_rows.shape
    return pl.pallas_call(
        cls_ln_kernel,
        out_shape=jax.ShapeDtypeStruct((B, D), jnp.float32),
        grid=(1,),
        in_specs=[pl.BlockSpec((B, D), lambda i: (0, 0)),
                  _const_spec((1, D)), _const_spec((1, D))],
        out_specs=pl.BlockSpec((B, D), lambda i: (0, 0)),
        compiler_params=pltpu.CompilerParams(
            dimension_semantics=("arbitrary",), vmem_limit_bytes=32 << 20),
    )(cls_rows, g, b)


# ---------------------------------------------------------------------------
# parameters
# ---------------------------------------------------------------------------
def init_params(key, vocab, max_len, d, n_layers, ffn_mult=4):
    """Deterministic synthetic ESM-style parameters (f32 'checkpoint' layout)."""
    keys = jax.random.split(key, 2 + n_layers)
    f = ffn_mult * d
    params = {
        'embed_tokens': 0.02 * jax.random.normal(keys[0], (vocab, d), jnp.float32),
        'embed_positions': 0.02 * jax.random.normal(keys[1], (max_len, d), jnp.float32),
        'final_ln_g': jnp.ones((1, d), jnp.float32),
        'final_ln_b': jnp.zeros((1, d), jnp.float32),
        'layers': [],
    }
    for li in range(n_layers):
        lk = jax.random.split(keys[2 + li], 6)
        params['layers'].append({
            'ln1_g': jnp.ones((1, d), jnp.float32), 'ln1_b': jnp.zeros((1, d), jnp.float32),
            'wq': 0.02 * jax.random.normal(lk[0], (d, d), jnp.float32), 'bq': jnp.zeros((1, d), jnp.float32),
            'wk': 0.02 * jax.random.normal(lk[1], (d, d), jnp.float32), 'bk': jnp.zeros((1, d), jnp.float32),
            'wv': 0.02 * jax.random.normal(lk[2], (d, d), jnp.float32), 'bv': jnp.zeros((1, d), jnp.float32),
            'wo': 0.02 * jax.random.normal(lk[3], (d, d), jnp.float32), 'bo': jnp.zeros((1, d), jnp.float32),
            'ln2_g': jnp.ones((1, d), jnp.float32), 'ln2_b': jnp.zeros((1, d), jnp.float32),
            'w1': 0.02 * jax.random.normal(lk[4], (d, f), jnp.float32), 'b1': jnp.zeros((1, f), jnp.float32),
            'w2': 0.02 * jax.random.normal(lk[5], (f, d), jnp.float32), 'b2': jnp.zeros((1, d), jnp.float32),
        })
    return params


def prepare_params(raw, *, num_heads):
    """Checkpoint -> device layout: fuse Q/K/V, fold the 1/sqrt(hd) attention scale into
    Wq/bq columns, cast matmul weights to bf16 (MXU-native); biases/LN/embeddings stay f32."""
    d = raw['embed_tokens'].shape[1]
    scale = 1.0 / math.sqrt(d // num_heads)
    prepared = {
        'embed_tokens': raw['embed_tokens'],
        'embed_positions': raw['embed_positions'],
        'final_ln_g': raw['final_ln_g'],
        'final_ln_b': raw['final_ln_b'],
        'layers': [],
    }
    for lp in raw['layers']:
        prepared['layers'].append({
            'ln1_g': lp['ln1_g'], 'ln1_b': lp['ln1_b'],
            'wqkv': jnp.concatenate([lp['wq'] * scale, lp['wk'], lp['wv']],
                                    axis=1).astype(jnp.bfloat16),
            'bqkv': jnp.concatenate([lp['bq'] * scale, lp['bk'], lp['bv']], axis=1),
            'wo': lp['wo'].astype(jnp.bfloat16), 'bo': lp['bo'],
            'ln2_g': lp['ln2_g'], 'ln2_b': lp['ln2_b'],
            'w1': lp['w1'].astype(jnp.bfloat16), 'b1': lp['b1'],
            'w2': lp['w2'].astype(jnp.bfloat16), 'b2': lp['b2'],
        })
    return prepared


# ---------------------------------------------------------------------------
# forward: mirrors ProteinEncoder.forward(x_s, compute_logits=False) -> (B, D) CLS hidden
# ---------------------------------------------------------------------------
def protein_encoder_forward(x_s, params, *, num_heads, rep_layer, target_token_idx=0):
    tokens = jnp.squeeze(x_s, axis=1)                    # x_s.squeeze(1): (B, 1, S) -> (B, S)
    B, S = tokens.shape
    D = params['embed_tokens'].shape[1]
    n_layers = len(params['layers'])
    assert 1 <= rep_layer <= n_layers
    assert D % num_heads == 0 and S >= 8
    hd = D // num_heads

    R = B * S
    tr = _pick_tile(R, _ROW_TILE_PREF)                   # row tile for LN/QKV + FFN kernels
    tq = _pick_tile(S, _ROW_TILE_PREF)                   # query tile for attention

    # glue: embedding lookup + learned positional embedding (not the hot path)
    x = jnp.take(params['embed_tokens'], tokens, axis=0) + params['embed_positions'][None, :S, :]
    x2d = x.astype(jnp.bfloat16).reshape(R, D)

    # Only the layers feeding representations[rep_layer] are run (output-identical to the
    # original, which runs the full stack but only returns this representation's CLS row).
    for li in range(rep_layer):
        lp = params['layers'][li]
        qkv = run_ln_qkv(x2d, lp, tr=tr).reshape(B, S, 3 * D)          # (B, S, 3D) bf16
        ctx = run_flash_attention(qkv, num_heads=num_heads, head_dim=hd, tq=tq)  # (B, S, D)
        x2d = run_attn_out_ffn(x2d, ctx.reshape(R, D), lp, tr=tr)      # (R, D) bf16

    x = x2d.reshape(B, S, D)
    if rep_layer == n_layers:
        # ESM: representations[num_layers] is taken after emb_layer_norm_after.
        cls = run_cls_ln(x[:, target_token_idx, :], params['final_ln_g'], params['final_ln_b'])
    else:
        cls = x[:, target_token_idx, :].astype(jnp.float32)
    return cls


if __name__ == "__main__":
    # Small but lane-dense config: ESM-like alphabet of 33 tokens, CLS at index 0, D = 128 lanes.
    B, S, D = 2, 16, 128
    VOCAB, MAX_LEN = 33, 64
    N_LAYERS, N_HEADS, REP_LAYER = 2, 4, 2

    key = jax.random.PRNGKey(0)
    pkey, tkey = jax.random.split(key)
    params = prepare_params(init_params(pkey, VOCAB, MAX_LEN, D, N_LAYERS), num_heads=N_HEADS)

    # x_s arrives as (B, 1, S) token ids, matching the squeeze(1) in forward().
    x_s = jax.random.randint(tkey, (B, 1, S), 0, VOCAB, dtype=jnp.int32)

    fwd = jax.jit(functools.partial(protein_encoder_forward,
                                    num_heads=N_HEADS, rep_layer=REP_LAYER))
    z_s = jax.block_until_ready(fwd(x_s, params))
    assert z_s.shape == (B, D)
    assert bool(jnp.all(jnp.isfinite(z_s)))

    # Also exercise the F-tiled FFN fallback path (used for large-D models on tight VMEM,
    # e.g. v7x) and check it matches the resident-weight path.
    lp0 = params['layers'][0]
    rows = B * S
    k1, k2 = jax.random.split(jax.random.PRNGKey(1))
    x_test = (0.05 * jax.random.normal(k1, (rows, D), jnp.float32)).astype(jnp.bfloat16)
    c_test = (0.05 * jax.random.normal(k2, (rows, D), jnp.float32)).astype(jnp.bfloat16)
    y_res = jax.block_until_ready(run_attn_out_ffn(x_test, c_test, lp0, tr=rows))
    y_til = jax.block_until_ready(
        run_attn_out_ffn(x_test, c_test, lp0, tr=rows, force_tiled=True, tf=256))
    assert y_res.shape == (rows, D) and y_til.shape == (rows, D)
    assert bool(jnp.allclose(y_res.astype(jnp.float32), y_til.astype(jnp.float32),
                             atol=2e-2, rtol=2e-2))

    print("KERNEL_OK")
</pallas_src>

<mosaic_0001>
module attributes {stable_mosaic.version = 11 : i64} {
  func.func @_probe(%arg0: i32, %arg1: memref<8x128xf32, #tpu.memory_space<vmem>>, %arg2: memref<8x128xf32, #tpu.memory_space<vmem>>) attributes {dimension_semantics = [#tpu.dimension_semantics<arbitrary>], iteration_bounds = array<i64: 1>, scalar_prefetch = 0 : i64, scratch_operands = 0 : i64, tpu.core_type = #tpu.core_type<tc>, window_params = [{pipeline_mode = #tpu.pipeline_mode<synchronous>, transform_indices = @transform_0, window_bounds = array<i64: 8, 128>}, {pipeline_mode = #tpu.pipeline_mode<synchronous>, transform_indices = @transform_1, window_bounds = array<i64: 8, 128>}]} {
    %c0 = arith.constant 0 : index
    %c0_0 = arith.constant 0 : index
    %0 = vector.load %arg1[%c0, %c0_0] : memref<8x128xf32, #tpu.memory_space<vmem>>, vector<8x128xf32>
    %c0_1 = arith.constant 0 : index
    %c0_2 = arith.constant 0 : index
    %1 = vector.load %arg2[%c0_1, %c0_2] : memref<8x128xf32, #tpu.memory_space<vmem>>, vector<8x128xf32>
    tpu.vector_store %arg2[%c0_1, %c0_2], %0 {strides = array<i32>} : memref<8x128xf32, #tpu.memory_space<vmem>>, vector<8x128xf32>,
    return
  }
  func.func @transform_0(%arg0: i32) -> (i32, i32) {
    %c0_i32 = arith.constant 0 : i32
    %c0_i32_0 = arith.constant 0 : i32
    %c0_i32_1 = arith.constant 0 : i32
    return %c0_i32, %c0_i32_0 : i32, i32
  }
  func.func @transform_1(%arg0: i32) -> (i32, i32) {
    %c0_i32 = arith.constant 0 : i32
    %c0_i32_0 = arith.constant 0 : i32
    %c0_i32_1 = arith.constant 0 : i32
    return %c0_i32, %c0_i32_0 : i32, i32
  }
}

module attributes {stable_mosaic.version = 11 : i64} {
  func.func @flash_attn_kernel(%arg0: i32, %arg1: i32, %arg2: i32, %arg3: memref<1x16x128xbf16, #tpu.memory_space<vmem>>, %arg4: memref<1x16x128xbf16, #tpu.memory_space<vmem>>, %arg5: memref<1x16x128xbf16, #tpu.memory_space<vmem>>, %arg6: memref<1x16x128xbf16, #tpu.memory_space<vmem>>) attributes {dimension_semantics = [#tpu.dimension_semantics<parallel>, #tpu.dimension_semantics<parallel>, #tpu.dimension_semantics<parallel>], iteration_bounds = array<i64: 2, 1, 1>, scalar_prefetch = 0 : i64, scratch_operands = 0 : i64, tpu.core_type = #tpu.core_type<tc>, window_params = [{transform_indices = @transform_0, window_bounds = array<i64: 1, 16, 128>}, {transform_indices = @transform_1, window_bounds = array<i64: 1, 16, 128>}, {transform_indices = @transform_2, window_bounds = array<i64: 1, 16, 128>}, {transform_indices = @transform_3, window_bounds = array<i64: 1, 16, 128>}]} {
    %c0 = arith.constant 0 : index
    %c0_0 = arith.constant 0 : index
    %c0_1 = arith.constant 0 : index
    %0 = vector.load %arg3[%c0, %c0_0, %c0_1] : memref<1x16x128xbf16, #tpu.memory_space<vmem>>, vector<1x16x128xbf16>
    %1 = vector.shape_cast %0 : vector<1x16x128xbf16> to vector<16x128xbf16>
    %c0_2 = arith.constant 0 : index
    %c0_3 = arith.constant 0 : index
    %c0_4 = arith.constant 0 : index
    %2 = vector.load %arg4[%c0_2, %c0_3, %c0_4] : memref<1x16x128xbf16, #tpu.memory_space<vmem>>, vector<1x16x128xbf16>
    %3 = vector.shape_cast %2 : vector<1x16x128xbf16> to vector<16x128xbf16>
    %c0_5 = arith.constant 0 : index
    %c0_6 = arith.constant 0 : index
    %c0_7 = arith.constant 0 : index
    %4 = vector.load %arg5[%c0_5, %c0_6, %c0_7] : memref<1x16x128xbf16, #tpu.memory_space<vmem>>, vector<1x16x128xbf16>
    %5 = vector.shape_cast %4 : vector<1x16x128xbf16> to vector<16x128xbf16>
    %6 = vector.extract_strided_slice %1 {offsets = [0, 0], sizes = [16, 32], strides = [1, 1]} : vector<16x128xbf16> to vector<16x32xbf16>
    %7 = vector.extract_strided_slice %3 {offsets = [0, 0], sizes = [16, 32], strides = [1, 1]} : vector<16x128xbf16> to vector<16x32xbf16>
    %8 = vector.extract_strided_slice %5 {offsets = [0, 0], sizes = [16, 32], strides = [1, 1]} : vector<16x128xbf16> to vector<16x32xbf16>
    %cst = arith.constant dense<0.000000e+00> : vector<16x16xf32>
    %9 = tpu.matmul %6, %7, %cst {dimension_numbers = #tpu.dot_dimension_numbers<[1], [1], [0], [0], [0, 0, 1, 0], [], []>} : vector<16x32xbf16>, vector<16x32xbf16>, vector<16x16xf32> -> vector<16x16xf32>
    %cst_8 = arith.constant dense<0xFF800000> : vector<16xf32>
    %10 = vector.multi_reduction <maximumf>, %9, %cst_8 [1] : vector<16x16xf32> to vector<16xf32>
    %11 = vector.shape_cast %10 : vector<16xf32> to vector<16x1xf32>
    %12 = vector.broadcast %11 : vector<16x1xf32> to vector<16x16xf32>
    %13 = arith.subf %9, %12 : vector<16x16xf32>
    %14 = math.exp %13 : vector<16x16xf32>
    %cst_9 = arith.constant dense<0.000000e+00> : vector<16xf32>
    %15 = vector.multi_reduction <add>, %14, %cst_9 [1] : vector<16x16xf32> to vector<16xf32>
    %16 = vector.shape_cast %15 : vector<16xf32> to vector<16x1xf32>
    %17 = arith.truncf %14 : vector<16x16xf32> to vector<16x16xbf16>
    %cst_10 = arith.constant dense<0.000000e+00> : vector<16x32xf32>
    %18 = tpu.matmul %17, %8, %cst_10 {dimension_numbers = #tpu.dot_dimension_numbers<[1], [0], [0], [1], [0, 0, 1, 1], [], []>} : vector<16x16xbf16>, vector<16x32xbf16>, vector<16x32xf32> -> vector<16x32xf32>
    %19 = tpu.reciprocal %16 {approx = true} : vector<16x1xf32> -> vector<16x1xf32>
    %20 = vector.broadcast %19 : vector<16x1xf32> to vector<16x32xf32>
    %21 = arith.mulf %18, %20 : vector<16x32xf32>
    %22 = vector.extract_strided_slice %1 {offsets = [0, 32], sizes = [16, 32], strides = [1, 1]} : vector<16x128xbf16> to vector<16x32xbf16>
    %23 = vector.extract_strided_slice %3 {offsets = [0, 32], sizes = [16, 32], strides = [1, 1]} : vector<16x128xbf16> to vector<16x32xbf16>
    %24 = vector.extract_strided_slice %5 {offsets = [0, 32], sizes = [16, 32], strides = [1, 1]} : vector<16x128xbf16> to vector<16x32xbf16>
    %cst_11 = arith.constant dense<0.000000e+00> : vector<16x16xf32>
    %25 = tpu.matmul %22, %23, %cst_11 {dimension_numbers = #tpu.dot_dimension_numbers<[1], [1], [0], [0], [0, 0, 1, 0], [], []>} : vector<16x32xbf16>, vector<16x32xbf16>, vector<16x16xf32> -> vector<16x16xf32>
    %cst_12 = arith.constant dense<0xFF800000> : vector<16xf32>
    %26 = vector.multi_reduction <maximumf>, %25, %cst_12 [1] : vector<16x16xf32> to vector<16xf32>
    %27 = vector.shape_cast %26 : vector<16xf32> to vector<16x1xf32>
    %28 = vector.broadcast %27 : vector<16x1xf32> to vector<16x16xf32>
    %29 = arith.subf %25, %28 : vector<16x16xf32>
    %30 = math.exp %29 : vector<16x16xf32>
    %cst_13 = arith.constant dense<0.000000e+00> : vector<16xf32>
    %31 = vector.multi_reduction <add>, %30, %cst_13 [1] : vector<16x16xf32> to vector<16xf32>
    %32 = vector.shape_cast %31 : vector<16xf32> to vector<16x1xf32>
    %33 = arith.truncf %30 : vector<16x16xf32> to vector<16x16xbf16>
    %cst_14 = arith.constant dense<0.000000e+00> : vector<16x32xf32>
    %34 = tpu.matmul %33, %24, %cst_14 {dimension_numbers = #tpu.dot_dimension_numbers<[1], [0], [0], [1], [0, 0, 1, 1], [], []>} : vector<16x16xbf16>, vector<16x32xbf16>, vector<16x32xf32> -> vector<16x32xf32>
    %35 = tpu.reciprocal %32 {approx = true} : vector<16x1xf32> -> vector<16x1xf32>
    %36 = vector.broadcast %35 : vector<16x1xf32> to vector<16x32xf32>
    %37 = arith.mulf %34, %36 : vector<16x32xf32>
    %38 = vector.extract_strided_slice %1 {offsets = [0, 64], sizes = [16, 32], strides = [1, 1]} : vector<16x128xbf16> to vector<16x32xbf16>
    %39 = vector.extract_strided_slice %3 {offsets = [0, 64], sizes = [16, 32], strides = [1, 1]} : vector<16x128xbf16> to vector<16x32xbf16>
    %40 = vector.extract_strided_slice %5 {offsets = [0, 64], sizes = [16, 32], strides = [1, 1]} : vector<16x128xbf16> to vector<16x32xbf16>
    %cst_15 = arith.constant dense<0.000000e+00> : vector<16x16xf32>
    %41 = tpu.matmul %38, %39, %cst_15 {dimension_numbers = #tpu.dot_dimension_numbers<[1], [1], [0], [0], [0, 0, 1, 0], [], []>} : vector<16x32xbf16>, vector<16x32xbf16>, vector<16x16xf32> -> vector<16x16xf32>
    %cst_16 = arith.constant dense<0xFF800000> : vector<16xf32>
    %42 = vector.multi_reduction <maximumf>, %41, %cst_16 [1] : vector<16x16xf32> to vector<16xf32>
    %43 = vector.shape_cast %42 : vector<16xf32> to vector<16x1xf32>
    %44 = vector.broadcast %43 : vector<16x1xf32> to vector<16x16xf32>
    %45 = arith.subf %41, %44 : vector<16x16xf32>
    %46 = math.exp %45 : vector<16x16xf32>
    %cst_17 = arith.constant dense<0.000000e+00> : vector<16xf32>
    %47 = vector.multi_reduction <add>, %46, %cst_17 [1] : vector<16x16xf32> to vector<16xf32>
    %48 = vector.shape_cast %47 : vector<16xf32> to vector<16x1xf32>
    %49 = arith.truncf %46 : vector<16x16xf32> to vector<16x16xbf16>
    %cst_18 = arith.constant dense<0.000000e+00> : vector<16x32xf32>
    %50 = tpu.matmul %49, %40, %cst_18 {dimension_numbers = #tpu.dot_dimension_numbers<[1], [0], [0], [1], [0, 0, 1, 1], [], []>} : vector<16x16xbf16>, vector<16x32xbf16>, vector<16x32xf32> -> vector<16x32xf32>
    %51 = tpu.reciprocal %48 {approx = true} : vector<16x1xf32> -> vector<16x1xf32>
    %52 = vector.broadcast %51 : vector<16x1xf32> to vector<16x32xf32>
    %53 = arith.mulf %50, %52 : vector<16x32xf32>
    %54 = vector.extract_strided_slice %1 {offsets = [0, 96], sizes = [16, 32], strides = [1, 1]} : vector<16x128xbf16> to vector<16x32xbf16>
    %55 = vector.extract_strided_slice %3 {offsets = [0, 96], sizes = [16, 32], strides = [1, 1]} : vector<16x128xbf16> to vector<16x32xbf16>
    %56 = vector.extract_strided_slice %5 {offsets = [0, 96], sizes = [16, 32], strides = [1, 1]} : vector<16x128xbf16> to vector<16x32xbf16>
    %cst_19 = arith.constant dense<0.000000e+00> : vector<16x16xf32>
    %57 = tpu.matmul %54, %55, %cst_19 {dimension_numbers = #tpu.dot_dimension_numbers<[1], [1], [0], [0], [0, 0, 1, 0], [], []>} : vector<16x32xbf16>, vector<16x32xbf16>, vector<16x16xf32> -> vector<16x16xf32>
    %cst_20 = arith.constant dense<0xFF800000> : vector<16xf32>
    %58 = vector.multi_reduction <maximumf>, %57, %cst_20 [1] : vector<16x16xf32> to vector<16xf32>
    %59 = vector.shape_cast %58 : vector<16xf32> to vector<16x1xf32>
    %60 = vector.broadcast %59 : vector<16x1xf32> to vector<16x16xf32>
    %61 = arith.subf %57, %60 : vector<16x16xf32>
    %62 = math.exp %61 : vector<16x16xf32>
    %cst_21 = arith.constant dense<0.000000e+00> : vector<16xf32>
    %63 = vector.multi_reduction <add>, %62, %cst_21 [1] : vector<16x16xf32> to vector<16xf32>
    %64 = vector.shape_cast %63 : vector<16xf32> to vector<16x1xf32>
    %65 = arith.truncf %62 : vector<16x16xf32> to vector<16x16xbf16>
    %cst_22 = arith.constant dense<0.000000e+00> : vector<16x32xf32>
    %66 = tpu.matmul %65, %56, %cst_22 {dimension_numbers = #tpu.dot_dimension_numbers<[1], [0], [0], [1], [0, 0, 1, 1], [], []>} : vector<16x16xbf16>, vector<16x32xbf16>, vector<16x32xf32> -> vector<16x32xf32>
    %67 = tpu.reciprocal %64 {approx = true} : vector<16x1xf32> -> vector<16x1xf32>
    %68 = vector.broadcast %67 : vector<16x1xf32> to vector<16x32xf32>
    %69 = arith.mulf %66, %68 : vector<16x32xf32>
    %70 = tpu.concatenate %21, %37, %53, %69 in 1 : vector<16x32xf32>, vector<16x32xf32>, vector<16x32xf32>, vector<16x32xf32> -> vector<16x128xf32>
    %71 = arith.truncf %70 : vector<16x128xf32> to vector<16x128xbf16>
    %c0_23 = arith.constant 0 : index
    %c0_24 = arith.constant 0 : index
    %c0_25 = arith.constant 0 : index
    %72 = vector.load %arg6[%c0_23, %c0_24, %c0_25] : memref<1x16x128xbf16, #tpu.memory_space<vmem>>, vector<1x16x128xbf16>
    %73 = vector.shape_cast %72 : vector<1x16x128xbf16> to vector<16x128xbf16>
    %74 = vector.shape_cast %71 : vector<16x128xbf16> to vector<1x16x128xbf16>
    tpu.vector_store %arg6[%c0_23, %c0_24, %c0_25], %74 {strides = array<i32>} : memref<1x16x128xbf16, #tpu.memory_space<vmem>>, vector<1x16x128xbf16>,
    return
  }
  func.func @transform_0(%arg0: i32, %arg1: i32, %arg2: i32) -> (i32, i32, i32) {
    %c0_i32 = arith.constant 0 : i32
    return %arg0, %arg2, %arg1 : i32, i32, i32
  }
  func.func @transform_1(%arg0: i32, %arg1: i32, %arg2: i32) -> (i32, i32, i32) {
    %c1_i32 = arith.constant 1 : i32
    %0 = arith.addi %c1_i32, %arg1 : i32
    %c0_i32 = arith.constant 0 : i32
    %c0_i32_0 = arith.constant 0 : i32
    return %arg0, %c0_i32, %0 : i32, i32, i32
  }
  func.func @transform_2(%arg0: i32, %arg1: i32, %arg2: i32) -> (i32, i32, i32) {
    %c2_i32 = arith.constant 2 : i32
    %0 = arith.addi %c2_i32, %arg1 : i32
    %c0_i32 = arith.constant 0 : i32
    %c0_i32_0 = arith.constant 0 : i32
    return %arg0, %c0_i32, %0 : i32, i32, i32
  }
  func.func @transform_3(%arg0: i32, %arg1: i32, %arg2: i32) -> (i32, i32, i32) {
    %c0_i32 = arith.constant 0 : i32
    return %arg0, %arg2, %arg1 : i32, i32, i32
  }
}

module attributes {stable_mosaic.version = 11 : i64} {
  func.func @ln_qkv_kernel(%arg0: i32, %arg1: memref<32x128xbf16, #tpu.memory_space<vmem>>, %arg2: memref<1x128xf32, #tpu.memory_space<vmem>>, %arg3: memref<1x128xf32, #tpu.memory_space<vmem>>, %arg4: memref<128x384xbf16, #tpu.memory_space<vmem>>, %arg5: memref<1x384xf32, #tpu.memory_space<vmem>>, %arg6: memref<32x384xbf16, #tpu.memory_space<vmem>>) attributes {dimension_semantics = [#tpu.dimension_semantics<parallel>], iteration_bounds = array<i64: 1>, scalar_prefetch = 0 : i64, scratch_operands = 0 : i64, tpu.core_type = #tpu.core_type<tc>, window_params = [{transform_indices = @transform_0, window_bounds = array<i64: 32, 128>}, {pipeline_mode = #tpu.pipeline_mode<synchronous>, transform_indices = @transform_1, window_bounds = array<i64: 1, 128>}, {pipeline_mode = #tpu.pipeline_mode<synchronous>, transform_indices = @transform_2, window_bounds = array<i64: 1, 128>}, {pipeline_mode = #tpu.pipeline_mode<synchronous>, transform_indices = @transform_3, window_bounds = array<i64: 128, 384>}, {pipeline_mode = #tpu.pipeline_mode<synchronous>, transform_indices = @transform_4, window_bounds = array<i64: 1, 384>}, {transform_indices = @transform_5, window_bounds = array<i64: 32, 384>}]} {
    %c0 = arith.constant 0 : index
    %c0_0 = arith.constant 0 : index
    %0 = vector.load %arg1[%c0, %c0_0] : memref<32x128xbf16, #tpu.memory_space<vmem>>, vector<32x128xbf16>
    %1 = arith.extf %0 : vector<32x128xbf16> to vector<32x128xf32>
    %c0_1 = arith.constant 0 : index
    %c0_2 = arith.constant 0 : index
    %2 = vector.load %arg2[%c0_1, %c0_2] : memref<1x128xf32, #tpu.memory_space<vmem>>, vector<1x128xf32>
    %c0_3 = arith.constant 0 : index
    %c0_4 = arith.constant 0 : index
    %3 = vector.load %arg3[%c0_3, %c0_4] : memref<1x128xf32, #tpu.memory_space<vmem>>, vector<1x128xf32>
    %cst = arith.constant dense<0.000000e+00> : vector<32xf32>
    %4 = vector.multi_reduction <add>, %1, %cst [1] : vector<32x128xf32> to vector<32xf32>
    %5 = vector.shape_cast %4 : vector<32xf32> to vector<32x1xf32>
    %cst_5 = arith.constant 1.280000e+02 : f32
    %6 = vector.broadcast %cst_5 : f32 to vector<32x1xf32>
    %7 = arith.divf %5, %6 : vector<32x1xf32>
    %8 = vector.broadcast %7 : vector<32x1xf32> to vector<32x128xf32>
    %9 = arith.subf %1, %8 : vector<32x128xf32>
    %10 = arith.mulf %9, %9 : vector<32x128xf32>
    %cst_6 = arith.constant dense<0.000000e+00> : vector<32xf32>
    %11 = vector.multi_reduction <add>, %10, %cst_6 [1] : vector<32x128xf32> to vector<32xf32>
    %12 = vector.shape_cast %11 : vector<32xf32> to vector<32x1xf32>
    %cst_7 = arith.constant 1.280000e+02 : f32
    %13 = vector.broadcast %cst_7 : f32 to vector<32x1xf32>
    %14 = arith.divf %12, %13 : vector<32x1xf32>
    %15 = vector.broadcast %7 : vector<32x1xf32> to vector<32x128xf32>
    %16 = arith.subf %1, %15 : vector<32x128xf32>
    %cst_8 = arith.constant 9.99999974E-6 : f32
    %17 = vector.broadcast %cst_8 : f32 to vector<32x1xf32>
    %18 = arith.addf %14, %17 : vector<32x1xf32>
    %19 = math.rsqrt %18 : vector<32x1xf32>
    %20 = vector.broadcast %19 : vector<32x1xf32> to vector<32x128xf32>
    %21 = arith.mulf %16, %20 : vector<32x128xf32>
    %22 = vector.broadcast %2 : vector<1x128xf32> to vector<32x128xf32>
    %23 = arith.mulf %21, %22 : vector<32x128xf32>
    %24 = vector.broadcast %3 : vector<1x128xf32> to vector<32x128xf32>
    %25 = arith.addf %23, %24 : vector<32x128xf32>
    %26 = arith.truncf %25 : vector<32x128xf32> to vector<32x128xbf16>
    %c0_9 = arith.constant 0 : index
    %c0_10 = arith.constant 0 : index
    %27 = vector.load %arg4[%c0_9, %c0_10] : memref<128x384xbf16, #tpu.memory_space<vmem>>, vector<128x384xbf16>
    %cst_11 = arith.constant dense<0.000000e+00> : vector<32x384xf32>
    %28 = tpu.matmul %26, %27, %cst_11 {dimension_numbers = #tpu.dot_dimension_numbers<[1], [0], [0], [1], [0, 0, 1, 1], [], []>} : vector<32x128xbf16>, vector<128x384xbf16>, vector<32x384xf32> -> vector<32x384xf32>
    %c0_12 = arith.constant 0 : index
    %c0_13 = arith.constant 0 : index
    %29 = vector.load %arg5[%c0_12, %c0_13] : memref<1x384xf32, #tpu.memory_space<vmem>>, vector<1x384xf32>
    %30 = vector.broadcast %29 : vector<1x384xf32> to vector<32x384xf32>
    %31 = arith.addf %28, %30 : vector<32x384xf32>
    %32 = arith.truncf %31 : vector<32x384xf32> to vector<32x384xbf16>
    %c0_14 = arith.constant 0 : index
    %c0_15 = arith.constant 0 : index
    %33 = vector.load %arg6[%c0_14, %c0_15] : memref<32x384xbf16, #tpu.memory_space<vmem>>, vector<32x384xbf16>
    tpu.vector_store %arg6[%c0_14, %c0_15], %32 {strides = array<i32>} : memref<32x384xbf16, #tpu.memory_space<vmem>>, vector<32x384xbf16>,
    return
  }
  func.func @transform_0(%arg0: i32) -> (i32, i32) {
    %c0_i32 = arith.constant 0 : i32
    %c0_i32_0 = arith.constant 0 : i32
    return %arg0, %c0_i32 : i32, i32
  }
  func.func @transform_1(%arg0: i32) -> (i32, i32) {
    %c0_i32 = arith.constant 0 : i32
    %c0_i32_0 = arith.constant 0 : i32
    %c0_i32_1 = arith.constant 0 : i32
    return %c0_i32, %c0_i32_0 : i32, i32
  }
  func.func @transform_2(%arg0: i32) -> (i32, i32) {
    %c0_i32 = arith.constant 0 : i32
    %c0_i32_0 = arith.constant 0 : i32
    %c0_i32_1 = arith.constant 0 : i32
    return %c0_i32, %c0_i32_0 : i32, i32
  }
  func.func @transform_3(%arg0: i32) -> (i32, i32) {
    %c0_i32 = arith.constant 0 : i32
    %c0_i32_0 = arith.constant 0 : i32
    %c0_i32_1 = arith.constant 0 : i32
    return %c0_i32, %c0_i32_0 : i32, i32
  }
  func.func @transform_4(%arg0: i32) -> (i32, i32) {
    %c0_i32 = arith.constant 0 : i32
    %c0_i32_0 = arith.constant 0 : i32
    %c0_i32_1 = arith.constant 0 : i32
    return %c0_i32, %c0_i32_0 : i32, i32
  }
  func.func @transform_5(%arg0: i32) -> (i32, i32) {
    %c0_i32 = arith.constant 0 : i32
    %c0_i32_0 = arith.constant 0 : i32
    return %arg0, %c0_i32 : i32, i32
  }
}

module attributes {stable_mosaic.version = 11 : i64} {
  func.func @attn_out_ffn_resident_kernel(%arg0: i32, %arg1: memref<32x128xbf16, #tpu.memory_space<vmem>>, %arg2: memref<32x128xbf16, #tpu.memory_space<vmem>>, %arg3: memref<128x128xbf16, #tpu.memory_space<vmem>>, %arg4: memref<1x128xf32, #tpu.memory_space<vmem>>, %arg5: memref<1x128xf32, #tpu.memory_space<vmem>>, %arg6: memref<1x128xf32, #tpu.memory_space<vmem>>, %arg7: memref<128x512xbf16, #tpu.memory_space<vmem>>, %arg8: memref<1x512xf32, #tpu.memory_space<vmem>>, %arg9: memref<512x128xbf16, #tpu.memory_space<vmem>>, %arg10: memref<1x128xf32, #tpu.memory_space<vmem>>, %arg11: memref<32x128xbf16, #tpu.memory_space<vmem>>) attributes {dimension_semantics = [#tpu.dimension_semantics<parallel>], iteration_bounds = array<i64: 1>, scalar_prefetch = 0 : i64, scratch_operands = 0 : i64, tpu.core_type = #tpu.core_type<tc>, window_params = [{transform_indices = @transform_0, window_bounds = array<i64: 32, 128>}, {transform_indices = @transform_1, window_bounds = array<i64: 32, 128>}, {pipeline_mode = #tpu.pipeline_mode<synchronous>, transform_indices = @transform_2, window_bounds = array<i64: 128, 128>}, {pipeline_mode = #tpu.pipeline_mode<synchronous>, transform_indices = @transform_3, window_bounds = array<i64: 1, 128>}, {pipeline_mode = #tpu.pipeline_mode<synchronous>, transform_indices = @transform_4, window_bounds = array<i64: 1, 128>}, {pipeline_mode = #tpu.pipeline_mode<synchronous>, transform_indices = @transform_5, window_bounds = array<i64: 1, 128>}, {pipeline_mode = #tpu.pipeline_mode<synchronous>, transform_indices = @transform_6, window_bounds = array<i64: 128, 512>}, {pipeline_mode = #tpu.pipeline_mode<synchronous>, transform_indices = @transform_7, window_bounds = array<i64: 1, 512>}, {pipeline_mode = #tpu.pipeline_mode<synchronous>, transform_indices = @transform_8, window_bounds = array<i64: 512, 128>}, {pipeline_mode = #tpu.pipeline_mode<synchronous>, transform_indices = @transform_9, window_bounds = array<i64: 1, 128>}, {transform_indices = @transform_10, window_bounds = array<i64: 32, 128>}]} {
    %c0 = arith.constant 0 : index
    %c0_0 = arith.constant 0 : index
    %0 = vector.load %arg2[%c0, %c0_0] : memref<32x128xbf16, #tpu.memory_space<vmem>>, vector<32x128xbf16>
    %c0_1 = arith.constant 0 : index
    %c0_2 = arith.constant 0 : index
    %1 = vector.load %arg3[%c0_1, %c0_2] : memref<128x128xbf16, #tpu.memory_space<vmem>>, vector<128x128xbf16>
    %cst = arith.constant dense<0.000000e+00> : vector<32x128xf32>
    %2 = tpu.matmul %0, %1, %cst {dimension_numbers = #tpu.dot_dimension_numbers<[1], [0], [0], [1], [0, 0, 1, 1], [], []>} : vector<32x128xbf16>, vector<128x128xbf16>, vector<32x128xf32> -> vector<32x128xf32>
    %c0_3 = arith.constant 0 : index
    %c0_4 = arith.constant 0 : index
    %3 = vector.load %arg4[%c0_3, %c0_4] : memref<1x128xf32, #tpu.memory_space<vmem>>, vector<1x128xf32>
    %4 = vector.broadcast %3 : vector<1x128xf32> to vector<32x128xf32>
    %5 = arith.addf %2, %4 : vector<32x128xf32>
    %c0_5 = arith.constant 0 : index
    %c0_6 = arith.constant 0 : index
    %6 = vector.load %arg1[%c0_5, %c0_6] : memref<32x128xbf16, #tpu.memory_space<vmem>>, vector<32x128xbf16>
    %7 = arith.extf %6 : vector<32x128xbf16> to vector<32x128xf32>
    %8 = arith.addf %7, %5 : vector<32x128xf32>
    %c0_7 = arith.constant 0 : index
    %c0_8 = arith.constant 0 : index
    %9 = vector.load %arg5[%c0_7, %c0_8] : memref<1x128xf32, #tpu.memory_space<vmem>>, vector<1x128xf32>
    %c0_9 = arith.constant 0 : index
    %c0_10 = arith.constant 0 : index
    %10 = vector.load %arg6[%c0_9, %c0_10] : memref<1x128xf32, #tpu.memory_space<vmem>>, vector<1x128xf32>
    %cst_11 = arith.constant dense<0.000000e+00> : vector<32xf32>
    %11 = vector.multi_reduction <add>, %8, %cst_11 [1] : vector<32x128xf32> to vector<32xf32>
    %12 = vector.shape_cast %11 : vector<32xf32> to vector<32x1xf32>
    %cst_12 = arith.constant 1.280000e+02 : f32
    %13 = vector.broadcast %cst_12 : f32 to vector<32x1xf32>
    %14 = arith.divf %12, %13 : vector<32x1xf32>
    %15 = vector.broadcast %14 : vector<32x1xf32> to vector<32x128xf32>
    %16 = arith.subf %8, %15 : vector<32x128xf32>
    %17 = arith.mulf %16, %16 : vector<32x128xf32>
    %cst_13 = arith.constant dense<0.000000e+00> : vector<32xf32>
    %18 = vector.multi_reduction <add>, %17, %cst_13 [1] : vector<32x128xf32> to vector<32xf32>
    %19 = vector.shape_cast %18 : vector<32xf32> to vector<32x1xf32>
    %cst_14 = arith.constant 1.280000e+02 : f32
    %20 = vector.broadcast %cst_14 : f32 to vector<32x1xf32>
    %21 = arith.divf %19, %20 : vector<32x1xf32>
    %22 = vector.broadcast %14 : vector<32x1xf32> to vector<32x128xf32>
    %23 = arith.subf %8, %22 : vector<32x128xf32>
    %cst_15 = arith.constant 9.99999974E-6 : f32
    %24 = vector.broadcast %cst_15 : f32 to vector<32x1xf32>
    %25 = arith.addf %21, %24 : vector<32x1xf32>
    %26 = math.rsqrt %25 : vector<32x1xf32>
    %27 = vector.broadcast %26 : vector<32x1xf32> to vector<32x128xf32>
    %28 = arith.mulf %23, %27 : vector<32x128xf32>
    %29 = vector.broadcast %9 : vector<1x128xf32> to vector<32x128xf32>
    %30 = arith.mulf %28, %29 : vector<32x128xf32>
    %31 = vector.broadcast %10 : vector<1x128xf32> to vector<32x128xf32>
    %32 = arith.addf %30, %31 : vector<32x128xf32>
    %33 = arith.truncf %32 : vector<32x128xf32> to vector<32x128xbf16>
    %c0_16 = arith.constant 0 : index
    %c0_17 = arith.constant 0 : index
    %34 = vector.load %arg7[%c0_16, %c0_17] : memref<128x512xbf16, #tpu.memory_space<vmem>>, vector<128x512xbf16>
    %cst_18 = arith.constant dense<0.000000e+00> : vector<32x512xf32>
    %35 = tpu.matmul %33, %34, %cst_18 {dimension_numbers = #tpu.dot_dimension_numbers<[1], [0], [0], [1], [0, 0, 1, 1], [], []>} : vector<32x128xbf16>, vector<128x512xbf16>, vector<32x512xf32> -> vector<32x512xf32>
    %c0_19 = arith.constant 0 : index
    %c0_20 = arith.constant 0 : index
    %36 = vector.load %arg8[%c0_19, %c0_20] : memref<1x512xf32, #tpu.memory_space<vmem>>, vector<1x512xf32>
    %37 = vector.broadcast %36 : vector<1x512xf32> to vector<32x512xf32>
    %38 = arith.addf %35, %37 : vector<32x512xf32>
    %39 = arith.mulf %38, %38 : vector<32x512xf32>
    %40 = arith.mulf %38, %39 : vector<32x512xf32>
    %cst_21 = arith.constant 4.471500e-02 : f32
    %41 = vector.broadcast %cst_21 : f32 to vector<32x512xf32>
    %42 = arith.mulf %41, %40 : vector<32x512xf32>
    %43 = arith.addf %38, %42 : vector<32x512xf32>
    %cst_22 = arith.constant 0.797884583 : f32
    %44 = vector.broadcast %cst_22 : f32 to vector<32x512xf32>
    %45 = arith.mulf %44, %43 : vector<32x512xf32>
    %46 = math.tanh %45 : vector<32x512xf32>
    %cst_23 = arith.constant 1.000000e+00 : f32
    %47 = vector.broadcast %cst_23 : f32 to vector<32x512xf32>
    %48 = arith.addf %47, %46 : vector<32x512xf32>
    %cst_24 = arith.constant 5.000000e-01 : f32
    %49 = vector.broadcast %cst_24 : f32 to vector<32x512xf32>
    %50 = arith.mulf %49, %48 : vector<32x512xf32>
    %51 = arith.mulf %38, %50 : vector<32x512xf32>
    %52 = arith.truncf %51 : vector<32x512xf32> to vector<32x512xbf16>
    %c0_25 = arith.constant 0 : index
    %c0_26 = arith.constant 0 : index
    %53 = vector.load %arg9[%c0_25, %c0_26] : memref<512x128xbf16, #tpu.memory_space<vmem>>, vector<512x128xbf16>
    %cst_27 = arith.constant dense<0.000000e+00> : vector<32x128xf32>
    %54 = tpu.matmul %52, %53, %cst_27 {dimension_numbers = #tpu.dot_dimension_numbers<[1], [0], [0], [1], [0, 0, 1, 1], [], []>} : vector<32x512xbf16>, vector<512x128xbf16>, vector<32x128xf32> -> vector<32x128xf32>
    %c0_28 = arith.constant 0 : index
    %c0_29 = arith.constant 0 : index
    %55 = vector.load %arg10[%c0_28, %c0_29] : memref<1x128xf32, #tpu.memory_space<vmem>>, vector<1x128xf32>
    %56 = vector.broadcast %55 : vector<1x128xf32> to vector<32x128xf32>
    %57 = arith.addf %54, %56 : vector<32x128xf32>
    %58 = arith.addf %8, %57 : vector<32x128xf32>
    %59 = arith.truncf %58 : vector<32x128xf32> to vector<32x128xbf16>
    %c0_30 = arith.constant 0 : index
    %c0_31 = arith.constant 0 : index
    %60 = vector.load %arg11[%c0_30, %c0_31] : memref<32x128xbf16, #tpu.memory_space<vmem>>, vector<32x128xbf16>
    tpu.vector_store %arg11[%c0_30, %c0_31], %59 {strides = array<i32>} : memref<32x128xbf16, #tpu.memory_space<vmem>>, vector<32x128xbf16>,
    return
  }
  func.func @transform_0(%arg0: i32) -> (i32, i32) {
    %c0_i32 = arith.constant 0 : i32
    %c0_i32_0 = arith.constant 0 : i32
    return %arg0, %c0_i32 : i32, i32
  }
  func.func @transform_1(%arg0: i32) -> (i32, i32) {
    %c0_i32 = arith.constant 0 : i32
    %c0_i32_0 = arith.constant 0 : i32
    return %arg0, %c0_i32 : i32, i32
  }
  func.func @transform_2(%arg0: i32) -> (i32, i32) {
    %c0_i32 = arith.constant 0 : i32
    %c0_i32_0 = arith.constant 0 : i32
    %c0_i32_1 = arith.constant 0 : i32
    return %c0_i32, %c0_i32_0 : i32, i32
  }
  func.func @transform_3(%arg0: i32) -> (i32, i32) {
    %c0_i32 = arith.constant 0 : i32
    %c0_i32_0 = arith.constant 0 : i32
    %c0_i32_1 = arith.constant 0 : i32
    return %c0_i32, %c0_i32_0 : i32, i32
  }
  func.func @transform_4(%arg0: i32) -> (i32, i32) {
    %c0_i32 = arith.constant 0 : i32
    %c0_i32_0 = arith.constant 0 : i32
    %c0_i32_1 = arith.constant 0 : i32
    return %c0_i32, %c0_i32_0 : i32, i32
  }
  func.func @transform_5(%arg0: i32) -> (i32, i32) {
    %c0_i32 = arith.constant 0 : i32
    %c0_i32_0 = arith.constant 0 : i32
    %c0_i32_1 = arith.constant 0 : i32
    return %c0_i32, %c0_i32_0 : i32, i32
  }
  func.func @transform_6(%arg0: i32) -> (i32, i32) {
    %c0_i32 = arith.constant 0 : i32
    %c0_i32_0 = arith.constant 0 : i32
    %c0_i32_1 = arith.constant 0 : i32
    return %c0_i32, %c0_i32_0 : i32, i32
  }
  func.func @transform_7(%arg0: i32) -> (i32, i32) {
    %c0_i32 = arith.constant 0 : i32
    %c0_i32_0 = arith.constant 0 : i32
    %c0_i32_1 = arith.constant 0 : i32
    return %c0_i32, %c0_i32_0 : i32, i32
  }
  func.func @transform_8(%arg0: i32) -> (i32, i32) {
    %c0_i32 = arith.constant 0 : i32
    %c0_i32_0 = arith.constant 0 : i32
    %c0_i32_1 = arith.constant 0 : i32
    return %c0_i32, %c0_i32_0 : i32, i32
  }
  func.func @transform_9(%arg0: i32) -> (i32, i32) {
    %c0_i32 = arith.constant 0 : i32
    %c0_i32_0 = arith.constant 0 : i32
    %c0_i32_1 = arith.constant 0 : i32
    return %c0_i32, %c0_i32_0 : i32, i32
  }
  func.func @transform_10(%arg0: i32) -> (i32, i32) {
    %c0_i32 = arith.constant 0 : i32
    %c0_i32_0 = arith.constant 0 : i32
    return %arg0, %c0_i32 : i32, i32
  }
}

module attributes {stable_mosaic.version = 11 : i64} {
  func.func @cls_ln_kernel(%arg0: i32, %arg1: memref<2x128xbf16, #tpu.memory_space<vmem>>, %arg2: memref<1x128xf32, #tpu.memory_space<vmem>>, %arg3: memref<1x128xf32, #tpu.memory_space<vmem>>, %arg4: memref<2x128xf32, #tpu.memory_space<vmem>>) attributes {dimension_semantics = [#tpu.dimension_semantics<arbitrary>], iteration_bounds = array<i64: 1>, scalar_prefetch = 0 : i64, scratch_operands = 0 : i64, tpu.core_type = #tpu.core_type<tc>, window_params = [{pipeline_mode = #tpu.pipeline_mode<synchronous>, transform_indices = @transform_0, window_bounds = array<i64: 2, 128>}, {pipeline_mode = #tpu.pipeline_mode<synchronous>, transform_indices = @transform_1, window_bounds = array<i64: 1, 128>}, {pipeline_mode = #tpu.pipeline_mode<synchronous>, transform_indices = @transform_2, window_bounds = array<i64: 1, 128>}, {pipeline_mode = #tpu.pipeline_mode<synchronous>, transform_indices = @transform_3, window_bounds = array<i64: 2, 128>}]} {
    %c0 = arith.constant 0 : index
    %c0_0 = arith.constant 0 : index
    %0 = vector.load %arg1[%c0, %c0_0] : memref<2x128xbf16, #tpu.memory_space<vmem>>, vector<2x128xbf16>
    %1 = arith.extf %0 : vector<2x128xbf16> to vector<2x128xf32>
    %c0_1 = arith.constant 0 : index
    %c0_2 = arith.constant 0 : index
    %2 = vector.load %arg2[%c0_1, %c0_2] : memref<1x128xf32, #tpu.memory_space<vmem>>, vector<1x128xf32>
    %c0_3 = arith.constant 0 : index
    %c0_4 = arith.constant 0 : index
    %3 = vector.load %arg3[%c0_3, %c0_4] : memref<1x128xf32, #tpu.memory_space<vmem>>, vector<1x128xf32>
    %cst = arith.constant dense<0.000000e+00> : vector<2xf32>
    %4 = vector.multi_reduction <add>, %1, %cst [1] : vector<2x128xf32> to vector<2xf32>
    %5 = vector.shape_cast %4 : vector<2xf32> to vector<2x1xf32>
    %cst_5 = arith.constant 1.280000e+02 : f32
    %6 = vector.broadcast %cst_5 : f32 to vector<2x1xf32>
    %7 = arith.divf %5, %6 : vector<2x1xf32>
    %8 = vector.broadcast %7 : vector<2x1xf32> to vector<2x128xf32>
    %9 = arith.subf %1, %8 : vector<2x128xf32>
    %10 = arith.mulf %9, %9 : vector<2x128xf32>
    %cst_6 = arith.constant dense<0.000000e+00> : vector<2xf32>
    %11 = vector.multi_reduction <add>, %10, %cst_6 [1] : vector<2x128xf32> to vector<2xf32>
    %12 = vector.shape_cast %11 : vector<2xf32> to vector<2x1xf32>
    %cst_7 = arith.constant 1.280000e+02 : f32
    %13 = vector.broadcast %cst_7 : f32 to vector<2x1xf32>
    %14 = arith.divf %12, %13 : vector<2x1xf32>
    %15 = vector.broadcast %7 : vector<2x1xf32> to vector<2x128xf32>
    %16 = arith.subf %1, %15 : vector<2x128xf32>
    %cst_8 = arith.constant 9.99999974E-6 : f32
    %17 = vector.broadcast %cst_8 : f32 to vector<2x1xf32>
    %18 = arith.addf %14, %17 : vector<2x1xf32>
    %19 = math.rsqrt %18 : vector<2x1xf32>
    %20 = vector.broadcast %19 : vector<2x1xf32> to vector<2x128xf32>
    %21 = arith.mulf %16, %20 : vector<2x128xf32>
    %22 = vector.broadcast %2 : vector<1x128xf32> to vector<2x128xf32>
    %23 = arith.mulf %21, %22 : vector<2x128xf32>
    %24 = vector.broadcast %3 : vector<1x128xf32> to vector<2x128xf32>
    %25 = arith.addf %23, %24 : vector<2x128xf32>
    %c0_9 = arith.constant 0 : index
    %c0_10 = arith.constant 0 : index
    %26 = vector.load %arg4[%c0_9, %c0_10] : memref<2x128xf32, #tpu.memory_space<vmem>>, vector<2x128xf32>
    tpu.vector_store %arg4[%c0_9, %c0_10], %25 {strides = array<i32>} : memref<2x128xf32, #tpu.memory_space<vmem>>, vector<2x128xf32>,
    return
  }
  func.func @transform_0(%arg0: i32) -> (i32, i32) {
    %c0_i32 = arith.constant 0 : i32
    %c0_i32_0 = arith.constant 0 : i32
    %c0_i32_1 = arith.constant 0 : i32
    return %c0_i32, %c0_i32_0 : i32, i32
  }
  func.func @transform_1(%arg0: i32) -> (i32, i32) {
    %c0_i32 = arith.constant 0 : i32
    %c0_i32_0 = arith.constant 0 : i32
    %c0_i32_1 = arith.constant 0 : i32
    return %c0_i32, %c0_i32_0 : i32, i32
  }
  func.func @transform_2(%arg0: i32) -> (i32, i32) {
    %c0_i32 = arith.constant 0 : i32
    %c0_i32_0 = arith.constant 0 : i32
    %c0_i32_1 = arith.constant 0 : i32
    return %c0_i32, %c0_i32_0 : i32, i32
  }
  func.func @transform_3(%arg0: i32) -> (i32, i32) {
    %c0_i32 = arith.constant 0 : i32
    %c0_i32_0 = arith.constant 0 : i32
    %c0_i32_1 = arith.constant 0 : i32
    return %c0_i32, %c0_i32_0 : i32, i32
  }
}

</mosaic_0001>

<bundles_post_ra>
// kernel: tpu_custom_call.1
= control target key start
LH: loop header
LB: loop body
LE: loop exit
PB: predicated region body
PF: predicated region fallthrough
CT: control target
= control target key end

     0   :  { %6 = vsyncpa [#allocation3], 0  ;;  %s124_s0 = inlined_call_operand.hbm [shape: f32[8,128], index: 0, kind: input, shape index: {}]   ;;  %s125_s1 = inlined_call_operand.hbm [shape: f32[8,128], index: 1, kind: output, shape index: {}]  }
   0x1   :  { %7 = vsyncpa [#allocation4], 0  ;;  %s88_s6 = smov [#allocation2]   ;;  %s40_s10 = scalar_lea.hbm %s124_s0, 128 }
   0x2   :  { %s14_s7 = sshll.u32 %s88_s6, 4  ;;  %p41_p0 = scmp.ne.s32.totalorder %s124_s0, %s40_s10  ;;  %s15_s7 = int_to_ptr.vmem [resolvable:$true] %s14_s7 }
   0x3   :  { %p44_p1 = scmp.lt.u32.totalorder %s40_s10, %s124_s0 }
   0x5   :  { %p46_p2 = pnand %p44_p1, %p41_p0 }
   0x7   :  { %49 = shalt.err (!%p46_p2)
}
   0x8   :  { %s50_s15 = scalar_lea.vmem %s15_s7, 128  ;;  %p55_p4 = scmp.lt.s32.totalorder %s15_s7, %s15_s7 }
   0x9   :  { %p51_p3 = scmp.ne.s32.totalorder %s15_s7, %s50_s15  ;;  %p56_p5 = scmp.lt.s32.totalorder %s50_s15, %s50_s15 }
   0xb   :  { %p57_p6 = por %p56_p5, %p55_p4 }
   0xd   :  { %p58_p7 = pnand %p57_p6, %p51_p3 }
   0xf   :  { %61 = shalt.err (!%p58_p7)
}
  0x10   :  { %17 = dma.hbm_to_vmem [thread:$0]  %s124_s0, 128, %s15_s7, [#allocation3]  }
  0x11   :  { %84 = dma.done.wait [#allocation3], 128  }
  0x12   :  { %85 = vsyncadd [#allocation3], 4294967168  ;;  %s89_s18 = smov [#allocation5]   ;;  %v21_v0 = vld [vmem:[#allocation2] sm:$0xff] }
  0x13   :  { %s29_s19 = sshll.u32 %s89_s18, 4  ;;  %22 = vst [vmem:[#allocation5] sm:$0xff] %v21_v0  ;;  %s30_s19 = int_to_ptr.vmem [resolvable:$true] %s29_s19 }
  0x14   :  { %s62_s20 = scalar_lea.vmem %s30_s19, 128  ;;  %p67_p9 = scmp.lt.s32.totalorder %s30_s19, %s30_s19 }
  0x15   :  { %p63_p8 = scmp.ne.s32.totalorder %s30_s19, %s62_s20  ;;  %p68_p10 = scmp.lt.s32.totalorder %s62_s20, %s62_s20 }
  0x17   :  { %p69_p11 = por %p68_p10, %p67_p9 }
  0x19   :  { %p70_p12 = pnand %p69_p11, %p63_p8 }
  0x1b   :  { %73 = shalt.err (!%p70_p12)
}
  0x1c   :  { %s74_s23 = scalar_lea.hbm %s125_s1, 128 }
  0x1d   :  { %p75_p13 = scmp.ne.s32.totalorder %s125_s1, %s74_s23  ;;  %p78_p0 = scmp.lt.u32.totalorder %s74_s23, %s125_s1 }
  0x1f   :  { %p80_p1 = pnand %p78_p0, %p75_p13 }
  0x21   :  { %83 = shalt.err (!%p80_p1)
}
  0x22   :  { %32 = dma.vmem_to_hbm [thread:$0]  %s30_s19, 128, %s125_s1, [#allocation4]  }
  0x23   :  { %86 = dma.done.wait [#allocation4], 128  }
  0x24   :  { %87 = vsyncadd [#allocation4], 4294967168 }
  0x25   :  { %36 = vsyncpa [#allocation3], 1 }
  0x26   :  { %37 = vsyncpa [#allocation4], 1 }

// kernel: protein_encoder_forward.7
= control target key start
LH: loop header
LB: loop body
LE: loop exit
PB: predicated region body
PF: predicated region fallthrough
CT: control target
= control target key end

     0   :  { %v551_v41 = vmov 0   ;;  %s713_s0 = inlined_call_operand.vmem [shape: bf16[32,128], index: 0, kind: input, shape index: {}]   ;;  %s714_s3 = inlined_call_operand.vmem [shape: bf16[128,384], index: 3, kind: input, shape index: {}]   ;;  %s715_s1 = inlined_call_operand.vmem [shape: f32[1,128], index: 1, kind: input, shape index: {}]   ;;  %s716_s2 = inlined_call_operand.vmem [shape: f32[1,128], index: 2, kind: input, shape index: {}]   ;;  %s717_s4 = inlined_call_operand.vmem [shape: f32[1,384], index: 4, kind: input, shape index: {}]   ;;  %s718_s5 = inlined_call_operand.vmem [shape: bf16[32,384], index: 5, kind: output, shape index: {}]  }
   0x1   :  { %v472_v0 = vld [vmem:[%s713_s0] sm:$0xff]   ;;  %v479_v1 = vld [vmem:[%s713_s0 + $0x8] sm:$0xff]   ;;  %v521_v29 = vld [vmem:[%s714_s3 + $0x30] ss:$12 sps:$4 sm:$0xff]   ;;  %307 = vmatprep.mubr.bf16.mxu0 %v551_v41 }
   0x2   :  { %v473_v2 = vunpack.c.l.bf16 %v472_v0  ;;  %v477_v3 = vunpack.c.l.bf16 %v479_v1  ;;  %v474_v4 = vunpack.c.h.bf16 %v472_v0  ;;  %v478_v5 = vunpack.c.h.bf16 %v479_v1  ;;  %v511_v6 = vld [vmem:[%s714_s3 + $0x4] ss:$12 sps:$4 sm:$0xff]   ;;  %v513_v7 = vld [vmem:[%s714_s3] ss:$12 sps:$4 sm:$0xff]   ;;  %v514_v8 = vld [vmem:[%s714_s3 + $0x1c] ss:$12 sps:$4 sm:$0xff]  }
   0x3   :  { %275 = vmatprep.subr.bf16.mxu0 %v511_v6  ;;  %v516_v9 = vld [vmem:[%s714_s3 + $0x8] ss:$12 sps:$4 sm:$0xff]   ;;  %v517_v26 = vld [vmem:[%s714_s3 + $0x18] ss:$12 sps:$4 sm:$0xff]   ;;  %v520_v28 = vld [vmem:[%s714_s3 + $0x20] ss:$12 sps:$4 sm:$0xff]  }
   0x4   :  { %31 = vadd.xlane.f32.xlu0 %v473_v2  ;;  %35 = vadd.xlane.f32.xlu1 %v477_v3  ;;  %v518_v27 = vld [vmem:[%s714_s3 + $0x34] ss:$12 sps:$4 sm:$0xff]   ;;  %v522_v30 = vld [vmem:[%s714_s3 + $0x4c] ss:$12 sps:$4 sm:$0xff]   ;;  %v526_v33 = vld [vmem:[%s714_s3 + $0x64] ss:$12 sps:$4 sm:$0xff]  }
   0x5   :  { %276 = vmatpush1.bf16.msra.mxu0 %v513_v7  ;;  %490 = vmatprep.subr.bf16.mxu1 %v516_v9  ;;  %v524_v31 = vld [vmem:[%s714_s3 + $0x38] ss:$12 sps:$4 sm:$0xff]   ;;  %v525_v32 = vld [vmem:[%s714_s3 + $0x48] ss:$12 sps:$4 sm:$0xff]   ;;  %v528_v34 = vld [vmem:[%s714_s3 + $0x50] ss:$12 sps:$4 sm:$0xff]  }
   0x6   :  { %277 = vmatprep.subr.bf16.mxu0 %v514_v8  ;;  %491 = vmatpush3.bf16.msra.mxu1 %v516_v9  ;;  %v529_v35 = vld [vmem:[%s714_s3 + $0x60] ss:$12 sps:$4 sm:$0xff]   ;;  %v530_v36 = vld [vmem:[%s714_s3 + $0x7c] ss:$12 sps:$4 sm:$0xff]   ;;  %v533_v38 = vld [vmem:[%s714_s3 + $0x78] ss:$12 sps:$4 sm:$0xff]  }
   0x7   :  { %492 = vmatprep.subr.bf16.mxu1 %v520_v28  ;;  %v532_v37 = vld [vmem:[%s714_s3 + $0x68] ss:$12 sps:$4 sm:$0xff]   ;;  %v536_v40 = vld [vmem:[%s714_s3 + $0x80] ss:$12 sps:$4 sm:$0xff]   ;;  %v537_v42 = vld [vmem:[%s714_s3 + $0x90] ss:$12 sps:$4 sm:$0xff]  }
   0x8   :  { %33 = vadd.xlane.f32.xlu0 %v474_v4  ;;  %37 = vadd.xlane.f32.xlu1 %v478_v5  ;;  %v534_v39 = vld [vmem:[%s714_s3 + $0x94] ss:$12 sps:$4 sm:$0xff]   ;;  %v538_v43 = vld [vmem:[%s714_s3 + $0xac] ss:$12 sps:$4 sm:$0xff]   ;;  %v542_v46 = vld [vmem:[%s714_s3 + $0xb0] ss:$12 sps:$4 sm:$0xff]  }
   0x9   :  { %278 = vmatpush1.bf16.msra.mxu0 %v517_v26  ;;  %v540_v44 = vld [vmem:[%s714_s3 + $0x98] ss:$12 sps:$4 sm:$0xff]   ;;  %v541_v45 = vld [vmem:[%s714_s3 + $0xa8] ss:$12 sps:$4 sm:$0xff]   ;;  %v429_v61 = vld [vmem:[%s715_s1] ss:$0 sm:$0xff] }
   0xa   :  { %279 = vmatprep.subr.bf16.mxu0 %v518_v27  ;;  %493 = vmatpush3.bf16.msra.mxu1 %v520_v28 }
   0xb   :  { %494 = vmatprep.subr.bf16.mxu1 %v524_v31 }
   0xd   :  { %280 = vmatpush1.bf16.msra.mxu0 %v521_v29 }
   0xe   :  { %281 = vmatprep.subr.bf16.mxu0 %v522_v30  ;;  %495 = vmatpush3.bf16.msra.mxu1 %v524_v31 }
   0xf   :  { %496 = vmatprep.subr.bf16.mxu1 %v528_v34 }
  0x11   :  { %282 = vmatpush1.bf16.msra.mxu0 %v525_v32 }
  0x12   :  { %283 = vmatprep.subr.bf16.mxu0 %v526_v33  ;;  %497 = vmatpush3.bf16.msra.mxu1 %v528_v34 }
  0x13   :  { %498 = vmatprep.subr.bf16.mxu1 %v532_v37 }
  0x15   :  { %284 = vmatpush1.bf16.msra.mxu0 %v529_v35 }
  0x16   :  { %285 = vmatprep.subr.bf16.mxu0 %v530_v36  ;;  %499 = vmatpush3.bf16.msra.mxu1 %v532_v37 }
  0x17   :  { %500 = vmatprep.subr.bf16.mxu1 %v536_v40 }
  0x19   :  { %286 = vmatpush1.bf16.msra.mxu0 %v533_v38 }
  0x1a   :  { %287 = vmatprep.subr.bf16.mxu0 %v534_v39  ;;  %501 = vmatpush3.bf16.msra.mxu1 %v536_v40 }
  0x1b   :  { %502 = vmatprep.subr.bf16.mxu1 %v540_v44 }
  0x1d   :  { %288 = vmatpush1.bf16.msra.mxu0 %v537_v42 }
  0x1e   :  { %289 = vmatprep.subr.bf16.mxu0 %v538_v43  ;;  %503 = vmatpush3.bf16.msra.mxu1 %v540_v44 }
  0x1f   :  { %504 = vmatprep.subr.bf16.mxu1 %v542_v46 }
  0x21   :  { %290 = vmatpush1.bf16.msra.mxu0 %v541_v45 }
  0x22   :  { %505 = vmatpush3.bf16.msra.mxu1 %v542_v46 }
  0x91   :  { %v32_v10 = vpop.xlane.xlu0 %31  ;;  %v36_v11 = vpop.xlane.xlu1 %35 }
  0x92   :  { %v40_v12 = vmul.f32 0.0078125, %v32_v10  ;;  %v42_v13 = vmul.f32 0.0078125, %v36_v11 }
  0x94   :  { %v600_v14 = vsub.f32 %v473_v2, %v40_v12  ;;  %v602_v15 = vsub.f32 %v477_v3, %v42_v13  ;;  %v430_v2 = vld [vmem:[%s716_s2] ss:$0 sm:$0xff] }
  0x95   :  { %v34_v16 = vpop.xlane.xlu0 %33  ;;  %v38_v17 = vpop.xlane.xlu1 %37 }
  0x96   :  { %v41_v18 = vmul.f32 0.0078125, %v34_v16  ;;  %v48_v19 = vmul.f32 %v600_v14, %v600_v14  ;;  %v43_v20 = vmul.f32 0.0078125, %v38_v17  ;;  %v50_v23 = vmul.f32 %v602_v15, %v602_v15 }
  0x97   :  { %v132_v16 = vlaneseq }
  0x98   :  { %v606_v21 = vsub.f32 %v474_v4, %v41_v18  ;;  %52 = vadd.xlane.f32.xlu0 %v48_v19  ;;  %v608_v22 = vsub.f32 %v478_v5, %v43_v20  ;;  %v130_v18 = vld [vmem:[%s717_s4] sm:$0x7] }
  0x99   :  { %v133_v17 = vshrl.u32 %v132_v16, 7 }
  0x9a   :  { %v49_v24 = vmul.f32 %v606_v21, %v606_v21  ;;  %v51_v25 = vmul.f32 %v608_v22, %v608_v22 }
  0x9b   :  { %v138_v19 = vsub.s32 1, %v133_v17 }
  0x9c   :  { %56 = vadd.xlane.f32.xlu0 %v50_v23  ;;  %54 = vadd.xlane.f32.xlu1 %v49_v24 }
  0xa0   :  { %58 = vadd.xlane.f32.xlu1 %v51_v25 }
 0x125   :  { %v53_v47 = vpop.xlane.xlu0 %52 }
 0x126   :  { %v60_v48 = vmul.f32 0.0078125, %v53_v47 }
 0x128   :  { %v64_v49 = vadd.f32 1e-05, %v60_v48 }
 0x129   :  { %v55_v50 = vpop.xlane.xlu1 %54  ;;  %v57_v51 = vpop.xlane.xlu0 %56 }
 0x12a   :  { %543 = vrsqrt.f32 %v64_v49  ;;  %v61_v52 = vmul.f32 0.0078125, %v55_v50  ;;  %v62_v53 = vmul.f32 0.0078125, %v57_v51 }
 0x12c   :  { %v65_v54 = vadd.f32 1e-05, %v61_v52  ;;  %v66_v55 = vadd.f32 1e-05, %v62_v53 }
 0x12d   :  { %v59_v56 = vpop.xlane.xlu1 %58 }
 0x12e   :  { %545 = vrsqrt.f32 %v65_v54  ;;  %v63_v57 = vmul.f32 0.0078125, %v59_v56 }
 0x12f   :  { %547 = vrsqrt.f32 %v66_v55 }
 0x130   :  { %v67_v58 = vadd.f32 1e-05, %v63_v57 }
 0x132   :  { %549 = vrsqrt.f32 %v67_v58 }
 0x134   :  { %v544_v59 = vpop.eup %543 }
 0x135   :  { %v72_v60 = vmul.f32 %v544_v59, %v600_v14 }
 0x137   :  { %v82_v1 = vmul.f32 %v429_v61, %v72_v60 }
 0x138   :  { %v546_v62 = vpop.eup %545 }
 0x139   :  { %v548_v63 = vpop.eup %547  ;;  %v73_v0 = vmul.f32 %v546_v62, %v606_v21  ;;  %v92_v6 = vadd.f32 %v430_v2, %v82_v1  ;;  %v142_v21 = vsub.s32 2, %v133_v17 }
 0x13a   :  { %v74_v3 = vmul.f32 %v548_v63, %v602_v15  ;;  %v134_v15 = vsub.s32 0, %v133_v17 }
 0x13b   :  { %v83_v4 = vmul.f32 %v429_v61, %v73_v0  ;;  %v143_v26 = vrot.slane %v130_v18, %v142_v21 }
 0x13c   :  { %v550_v5 = vpop.eup %549  ;;  %v84_v9 = vmul.f32 %v429_v61, %v74_v3  ;;  %v135_v20 = vrot.slane %v130_v18, %v134_v15 }
 0x13d   :  { %v93_v7 = vadd.f32 %v430_v2, %v83_v4  ;;  %v75_v8 = vmul.f32 %v550_v5, %v608_v22  ;;  %v139_v22 = vrot.slane %v130_v18, %v138_v19 }
 0x13e   :  { %v94_v12 = vadd.f32 %v430_v2, %v84_v9 }
 0x13f   :  { %v96_v10 = vpack.c.bf16 %v93_v7, %v92_v6  ;;  %v85_v11 = vmul.f32 %v429_v61, %v75_v8 }
 0x141   :  { %308 = vmatmul.mubr.bf16.vlgmr.msra.gmra.mrb[0].mxu0 %v96_v10  ;;  %506 = vmatprep.mubr.bf16.mxu1 %v96_v10  ;;  %v95_v13 = vadd.f32 %v430_v2, %v85_v11 }
 0x142   :  { %317 = vmatprep.mubr.bf16.mxu0 %v551_v41 }
 0x143   :  { %v97_v14 = vpack.c.bf16 %v95_v13, %v94_v12 }
 0x145   :  { %507 = vmatmul.mubr.bf16.vlgmr.msra.gmra.mrb[0].mxu1 %v97_v14 }
 0x149   :  { %318 = vmatmul.mubr.bf16.gmra.mrb[4].mxu0 %v97_v14 }
 0x214   :  { %v309_v23 = vpop.f32.mrb[0].mxu0 }
 0x215   :  { %v310_v24 = vadd.f32 %v309_v23, %v135_v20  ;;  %v311_v25 = vpop.f32.mrb[1].mxu0 }
 0x216   :  { %v312_v27 = vadd.f32 %v311_v25, %v139_v22  ;;  %v313_v28 = vpop.f32.mrb[2].mxu0 }
 0x217   :  { %v314_v29 = vadd.f32 %v313_v28, %v135_v20  ;;  %v315_v30 = vpop.f32.mrb[3].mxu0 }
 0x218   :  { %v463_v31 = vpack.c.bf16 %v312_v27, %v310_v24  ;;  %v316_v32 = vadd.f32 %v315_v30, %v139_v22  ;;  %v508_v33 = vpop.f32.mrb[0].mxu1 }
 0x219   :  { %v371_v34 = vadd.f32 %v508_v33, %v143_v26  ;;  %v362_v35 = vpop.f32.mrb[1].mxu1 }
 0x21a   :  { %417 = vst [vmem:[%s718_s5] sm:$0xff] %v463_v31  ;;  %v465_v36 = vpack.c.bf16 %v316_v32, %v314_v29  ;;  %v363_v37 = vadd.f32 %v362_v35, %v143_v26  ;;  %v509_v38 = vpop.f32.mrb[2].mxu1 }
 0x21b   :  { %v468_v39 = vpack.c.bf16 %v371_v34, %v371_v34  ;;  %v374_v40 = vadd.f32 %v509_v38, %v143_v26  ;;  %v365_v41 = vpop.f32.mrb[3].mxu1 }
 0x21c   :  { %419 = vst [vmem:[%s718_s5 + $0xc] sm:$0xff] %v465_v36  ;;  %v464_v42 = vpack.c.bf16 %v363_v37, %v363_v37  ;;  %v366_v43 = vadd.f32 %v365_v41, %v143_v26  ;;  %v319_v44 = vpop.f32.mrb[4].mxu0 }
 0x21d   :  { %422 = vst [vmem:[%s718_s5 + $0x20] sm:$0xf] %v468_v39  ;;  %v470_v45 = vpack.c.bf16 %v374_v40, %v374_v40  ;;  %v320_v46 = vadd.f32 %v319_v44, %v135_v20  ;;  %v321_v47 = vpop.f32.mrb[5].mxu0 }
 0x21e   :  { %418 = vst [vmem:[%s718_s5 + $0x8] sm:$0xf] %v464_v42  ;;  %v466_v48 = vpack.c.bf16 %v366_v43, %v366_v43  ;;  %v322_v49 = vadd.f32 %v321_v47, %v139_v22  ;;  %v323_v50 = vpop.f32.mrb[6].mxu0 }
 0x21f   :  { %424 = vst [vmem:[%s718_s5 + $0x2c] sm:$0xf] %v470_v45  ;;  %v324_v51 = vadd.f32 %v323_v50, %v135_v20  ;;  %v325_v52 = vpop.f32.mrb[7].mxu0 }
 0x220   :  { %420 = vst [vmem:[%s718_s5 + $0x14] sm:$0xf] %v466_v48  ;;  %v467_v53 = vpack.c.bf16 %v322_v49, %v320_v46  ;;  %v326_v54 = vadd.f32 %v325_v52, %v139_v22 }
 0x222   :  { %421 = vst [vmem:[%s718_s5 + $0x18] sm:$0xff] %v467_v53  ;;  %v469_v55 = vpack.c.bf16 %v326_v54, %v324_v51 }
 0x224   :  { %423 = vst [vmem:[%s718_s5 + $0x24] sm:$0xff] %v469_v55 }

// kernel: protein_encoder_forward.8
= control target key start
LH: loop header
LB: loop body
LE: loop exit
PB: predicated region body
PF: predicated region fallthrough
CT: control target
= control target key end

     0   :  { %s1368_s12 = smov 0   ;;  %s1370_s13 = smov 0   ;;  %s1545_s0 = inlined_call_operand.vmem [shape: bf16[2,16,384], index: 0, kind: input, shape index: {}, may-alias: {0,1,2}]   ;;  %s1546_s1 = inlined_call_operand.vmem [shape: bf16[2,16,384], index: 1, kind: input, shape index: {}, may-alias: {0,1,2}]   ;;  %s1547_s2 = inlined_call_operand.vmem [shape: bf16[2,16,384], index: 2, kind: input, shape index: {}, may-alias: {0,1,2}]   ;;  %s1548_s3 = inlined_call_operand.vmem [shape: bf16[2,16,128], index: 3, kind: output, shape index: {}]  }
   0x1   :  { %s1372_s14 = smov 0   ;;  %s1374_s15 = smov 0  }
   0x2   :  { %s1376_s16 = smov 0  }
   0x3 LB: > { %s32_s17 = sadd.s32 1, %s1337_s15  ;;  %p50_p1 = scmp.ne.s32.totalorder %s1329_s13, %s1325_s12  ;;  %s1341_s16 = sphi %s1376_s16, %s13_s16   ;;  %s1337_s15 = sphi %s1374_s15, %s1553_s15   ;;  %s1333_s14 = sphi %s1372_s14, %s1552_s14   ;;  %s1329_s13 = sphi %s1370_s13, %s1551_s13   ;;  %s1325_s12 = sphi %s1368_s12, %s1550_s12  }
   0x4   : > { %p34_p0 = scmp.ge.s32.totalorder %s32_s17, 2  ;;  %p51_p2 = scmp.eq.s32.totalorder %s1341_s16, 0 }
   0x5   : > { %s43_s20 = sadd.s32 1, %s1329_s13  ;;  %p1103_p5 = scmp.ge.s32.totalorder %s1341_s16, 2 }
   0x6   : > { %s1555_s17 = smov (%p34_p0, %s32_s17), 0  ;;  %p1399_p3 = por %p51_p2, %p50_p1 }
   0x7   : > { %s36_s19 = ssub.s32 %s1337_s15, %s1555_s17  ;;  %166 = sbr.rel (%p1103_p5) target bundleno = 35 (0x23), region = 16 }
   0x8   : > { %p41_p4 = scmp.eq.s32.totalorder %s36_s19, 0 }
   0xa   : > { %s1407_s21 = scalar_select %p41_p4, %s1329_s13, %s43_s20  }
   0xe   : > { %169 = sbr.rel (!%p1399_p3) target bundleno = 21 (0x15), region = 20  ;;  %s171_s22 = sand.u32 (%p1399_p3), 1, %s1329_s13  }
   0xf   : > { %s1207_s23 = smul.u32 (%p1399_p3), 24, %s1337_s15  ;;  %s1104_s24 = sshll.u32 (%p1399_p3), %s171_s22, 3 }
  0x10   : > { %s173_s28 = scalar_lea.vmem (%p1399_p3), [#allocation2], %s1104_s24 }
  0x11   : > { %s180_s27 = scalar_lea.vmem (%p1399_p3), %s1545_s0, %s1207_s23 }
  0x12   : > { %v196_v0 = vld [vmem:[%s180_s27] sm:$0xf] (%p1399_p3)  ;;  %v198_v1 = vld [vmem:[%s180_s27 + $0xc] sm:$0xf] (%p1399_p3) }
  0x13   : > { %197 = vst [vmem:[%s173_s28] sm:$0xf] (%p1399_p3), %v196_v0  ;;  %199 = vst [vmem:[%s173_s28 + $0x4] sm:$0xf] (%p1399_p3), %v198_v1 }
  0x15 PF: > { %226 = sbr.rel (!%p1399_p3) target bundleno = 28 (0x1c), region = 61  ;;  %s228_s29 = sand.u32 (%p1399_p3), 1, %s1329_s13  }
  0x16   : > { %s1107_s30 = smul.u32 (%p1399_p3), 24, %s1337_s15  ;;  %s1106_s4 = sshll.u32 (%p1399_p3), %s228_s29, 3 }
  0x17   : > { %s230_s8 = scalar_lea.vmem (%p1399_p3), [#allocation3], %s1106_s4 }
  0x18   : > { %s1003_s7 = scalar_lea.vmem (%p1399_p3), %s1546_s1, %s1107_s30 }
  0x19   : > { %v1108_v2 = vld [vmem:[%s1003_s7 + $0x4] sm:$0xf] (%p1399_p3)  ;;  %v1109_v3 = vld [vmem:[%s1003_s7 + $0x10] sm:$0xf] (%p1399_p3) }
  0x1a   : > { %252 = vst [vmem:[%s230_s8] sm:$0xf] (%p1399_p3), %v1108_v2  ;;  %254 = vst [vmem:[%s230_s8 + $0x4] sm:$0xf] (%p1399_p3), %v1109_v3 }
  0x1c PF: > { %281 = sbr.rel (!%p1399_p3) target bundleno = 35 (0x23), region = 102  ;;  %s283_s9 = sand.u32 (%p1399_p3), 1, %s1329_s13  }
  0x1d   : > { %s1111_s10 = smul.u32 (%p1399_p3), 24, %s1337_s15  ;;  %s1110_s11 = sshll.u32 (%p1399_p3), %s283_s9, 3 }
  0x1e   : > { %s285_s23 = scalar_lea.vmem (%p1399_p3), [#allocation4], %s1110_s11 }
  0x1f   : > { %s1010_s22 = scalar_lea.vmem (%p1399_p3), %s1547_s2, %s1111_s10 }
  0x20   : > { %v1112_v4 = vld [vmem:[%s1010_s22 + $0x8] sm:$0xf] (%p1399_p3)  ;;  %v1113_v5 = vld [vmem:[%s1010_s22 + $0x14] sm:$0xf] (%p1399_p3) }
  0x21   : > { %307 = vst [vmem:[%s285_s23] sm:$0xf] (%p1399_p3), %v1112_v4  ;;  %309 = vst [vmem:[%s285_s23 + $0x4] sm:$0xf] (%p1399_p3), %v1113_v5 }
  0x23 PF: > { %p1114_p6 = scmp.ge.s32.totalorder %s1341_s16, 1  ;;  %p335_p7 = scmp.lt.s32.totalorder %s1341_s16, 3 }
  0x25   : > { %p336_p8 = pnand %p1114_p6, %p335_p7 }
  0x26   : > { %s342_s18 = sand.u32 (!%p336_p8), 1, %s1325_s12   ;;  %v1343_v6 = vmov (!%p336_p8), 0.0   ;;  %vm1344_vm0 = vmmov (!%p336_p8), 0   ;;  %vm427_vm1 = vcmask (!%p336_p8), 261120   ;;  %s1345_s26 = smov (!%p336_p8), 96   ;;  %vm475_vm2 = vcmask (!%p336_p8), 130048  }
  0x27   : > { %339 = sbr.rel (%p336_p8) target bundleno = 1210 (0x4ba), region = 143  ;;  %1159 = vmatprep.subr.bf16.mxu0 (!%p336_p8), %v1343_v6  ;;  %s1435_s24 = sshll.u32 (!%p336_p8), %s342_s18, 3  ;;  %1161 = vmatprep.mubr.msk.bf16.mxu0 (!%p336_p8), %vm1344_vm0, %v1343_v6  ;;  %vm938_vm3 = vcmask (!%p336_p8), 523264   ;;  %vm941_vm4 = vcmask (!%p336_p8), 785408  }
  0x28   : > { %1165 = vmatprep.subr.bf16.mxu1 (!%p336_p8), %v1343_v6  ;;  %1167 = vmatprep.mubr.msk.bf16.mxu1 (!%p336_p8), %vm1344_vm0, %v1343_v6  ;;  %s351_s25 = scalar_lea.vmem (!%p336_p8), [#allocation3], %s1435_s24  ;;  %s344_s12 = scalar_lea.vmem (!%p336_p8), [#allocation2], %s1435_s24 }
  0x29   : > { %v1268_v7 = vld [vmem:[%s351_s25] sm:$0xff] (!%p336_p8)   ;;  %v1269_v9 = vld [vmem:[%s344_s12] sm:$0xff] (!%p336_p8)   ;;  %s1346_s27 = smov (!%p336_p8), 64   ;;  %s1347_s28 = smov (!%p336_p8), 32  }
  0x2a   : > { %v432_v8 = vsel (!%p336_p8), %vm427_vm1, %v1268_v7, 0  ;;  %551 = vrot.lane.b32.xlu1 (!%p336_p8), %v1268_v7, %s1345_s26  ;;  %s358_s29 = scalar_lea.vmem (!%p336_p8), [#allocation4], %s1435_s24  ;;  %p398_p9 = scmp.lt.s32.totalorder (!%p336_p8), %s1333_s14, 1 }
  0x2b   : > { %1160 = vmatpush3.bf16.xpose.msra.mxu0 (!%p336_p8), %v432_v8  ;;  %v1457_v16 = vld [vmem:[%s358_s29] sm:$0xff] (!%p336_p8)  }
  0x2c   : > { %1177 = vmatprep.subr.bf16.mxu0 (!%p336_p8), %v1343_v6  ;;  %1166 = vmatpush3.bf16.msra.mxu1 (!%p336_p8), %v1457_v16 }
  0x2d   : > { %1171 = vmatprep.subr.bf16.mxu1 (!%p336_p8), %v1343_v6 }
  0x2e   : > { %549 = vrot.lane.b32.xlu1 %v1269_v9, %s1345_s26  ;;  %s1557_s14 = smov (!%p398_p9, %s1333_s14), 1 }
  0x2f   : > { %s1135_s30 = sshll.u32 %s1557_s14, 3 }
  0x30   : > { %s408_s6 = scalar_lea.vmem %s1548_s3, %s1135_s30 }
  0x32   : > { %1162 = vmatmul.mubr.msk.bf16.vlgmr.msra.gmra.mrb[0].mxu0 %vm427_vm1, %v1269_v9  ;;  %670 = vrot.lane.b32.xlu1 %v1269_v9, %s1346_s27 }
  0x33   : > { %1179 = vmatprep.mubr.msk.bf16.mxu0 %vm1344_vm0, %v1343_v6 }
  0x36   : > { %793 = vrot.lane.b32.xlu1 %v1268_v7, %s1347_s28 }
  0x3a   : > { %791 = vrot.lane.b32.xlu1 %v1269_v9, %s1347_s28 }
  0x9c   : > { %v552_v23 = vpop.permute.xlu1 %551 }
  0x9d   : > { %v557_v26 = vsel %vm427_vm1, %v552_v23, 0 }
  0xa0   : > { %v550_v28 = vpop.permute.xlu1 %549 }
  0xa4   : > { %v671_v30 = vpop.permute.xlu1 %670 }
  0xa8   : > { %v794_v32 = vpop.permute.xlu1 %793 }
  0xa9   : > { %v799_v33 = vsel %vm427_vm1, %v794_v32, 0 }
  0xac   : > { %v792_v34 = vpop.permute.xlu1 %791 }
 0x105   : > { %v468_v10 = vpop.f32.mrb[0].mxu0 }
 0x106   : > { %v1163_v11 = vpop.f32.mrb[1].mxu0  ;;  %v476_v12 = vsel %vm475_vm2, %v468_v10, -inf }
 0x107   : > { %477 = vmax.xlane.f32.xlu0 %v476_v12  ;;  %v471_v13 = vpop.f32.mrb[2].mxu0 }
 0x108   : > { %v1164_v14 = vpop.f32.mrb[3].mxu0  ;;  %v479_v15 = vsel %vm475_vm2, %v471_v13, -inf }
 0x10b   : > { %480 = vmax.xlane.f32.xlu0 %v479_v15 }
 0x121   : > { %672 = vrot.lane.b32.xlu0 %v1268_v7, %s1346_s27 }
 0x194   : > { %v478_v17 = vpop.xlane.xlu0 %477 }
 0x195   : > { %v482_v18 = vsub.f32 %v468_v10, %v478_v17 }
 0x197   : > { %v484_v19 = vmul.f32 1.442695, %v482_v18 }
 0x198   : > { %v481_v20 = vpop.xlane.xlu0 %480 }
 0x199   : > { %v483_v21 = vsub.f32 %v471_v13, %v481_v20  ;;  %1271 = vpow2.f32 %v484_v19 }
 0x19b   : > { %v486_v22 = vmul.f32 1.442695, %v483_v21 }
 0x19c   : > { %v673_v29 = vpop.permute.xlu0 %672 }
 0x19d   : > { %1273 = vpow2.f32 %v486_v22  ;;  %v678_v31 = vsel %vm427_vm1, %v673_v29, 0 }
 0x1a3   : > { %v1462_v24 = vpop.eup %1271 }
 0x1a4   : > { %v488_v23 = vsel %vm475_vm2, %v1462_v24, 0.0 }
 0x1a7   : > { %v1464_v25 = vpop.eup %1273 }
 0x1a8   : > { %v494_v27 = vpack.c.bf16 %v1464_v25, %v1462_v24 }
 0x1aa   : > { %1168 = vmatmul.mubr.msk.bf16.vlgmr.msra.gmra.mrb[0].mxu1 %vm475_vm2, %v494_v27 }
 0x1ab   : > { %1172 = vmatpush3.bf16.xpose.msra.mxu1 %v557_v26  ;;  %1173 = vmatprep.mubr.msk.bf16.mxu1 %vm1344_vm0, %v1343_v6 }
 0x1ac   : > { %1183 = vmatprep.subr.bf16.mxu1 %v1343_v6 }
 0x1b2   : > { %1174 = vmatmul.mubr.msk.bf16.vlgmr.msra.gmra.mrb[4].mxu1 %vm427_vm1, %v550_v28 }
 0x1b3   : > { %1184 = vmatpush3.bf16.xpose.msra.mxu1 %v678_v31  ;;  %1185 = vmatprep.mubr.msk.bf16.mxu1 %vm1344_vm0, %v1343_v6 }
 0x1b4   : > { %1195 = vmatprep.subr.bf16.mxu1 %v1343_v6 }
 0x1ba   : > { %1186 = vmatmul.mubr.msk.bf16.vlgmr.msra.gmra.mrb[8].mxu1 %vm427_vm1, %v671_v30 }
 0x1bb   : > { %1196 = vmatpush3.bf16.xpose.msra.mxu1 %v799_v33  ;;  %1197 = vmatprep.mubr.msk.bf16.mxu1 %vm1344_vm0, %v1343_v6 }
 0x1c2   : > { %1198 = vmatmul.mubr.msk.bf16.vlgmr.msra.gmra.mrb[12].mxu1 %vm427_vm1, %v792_v34 }
 0x27d   : > { %v1483_v35 = vpop.f32.mrb[0].mxu1 }
 0x27e   : > { %v1169_v36 = vpop.f32.mrb[1].mxu1 }
 0x27f   : > { %v1485_v37 = vpop.f32.mrb[2].mxu1 }
 0x280   : > { %v1170_v38 = vpop.f32.mrb[3].mxu1 }
 0x285   : > { %v593_v39 = vpop.f32.mrb[4].mxu1 }
 0x286   : > { %v1175_v40 = vpop.f32.mrb[5].mxu1  ;;  %v600_v41 = vsel %vm475_vm2, %v593_v39, -inf }
 0x287   : > { %601 = vmax.xlane.f32.xlu1 %v600_v41  ;;  %v596_v42 = vpop.f32.mrb[6].mxu1 }
 0x288   : > { %v1176_v43 = vpop.f32.mrb[7].mxu1  ;;  %v603_v44 = vsel %vm475_vm2, %v596_v42, -inf }
 0x289   : > { %604 = vmax.xlane.f32.xlu0 %v603_v44 }
 0x28d   : > { %v714_v45 = vpop.f32.mrb[8].mxu1 }
 0x28e   : > { %v1187_v46 = vpop.f32.mrb[9].mxu1  ;;  %v721_v47 = vsel %vm475_vm2, %v714_v45, -inf }
 0x28f   : > { %722 = vmax.xlane.f32.xlu1 %v721_v47  ;;  %v717_v48 = vpop.f32.mrb[10].mxu1 }
 0x290   : > { %v1188_v49 = vpop.f32.mrb[11].mxu1  ;;  %v724_v50 = vsel %vm475_vm2, %v717_v48, -inf }
 0x293   : > { %725 = vmax.xlane.f32.xlu1 %v724_v50 }
 0x295   : > { %v835_v51 = vpop.f32.mrb[12].mxu1 }
 0x296   : > { %v842_v52 = vsel %vm475_vm2, %v835_v51, -inf  ;;  %v1199_v53 = vpop.f32.mrb[13].mxu1 }
 0x297   : > { %843 = vmax.xlane.f32.xlu0 %v842_v52  ;;  %v838_v54 = vpop.f32.mrb[14].mxu1 }
 0x298   : > { %v1200_v55 = vpop.f32.mrb[15].mxu1  ;;  %v845_v56 = vsel %vm475_vm2, %v838_v54, -inf }
 0x2a4   : > { %740 = vrot.lane.b32.xlu1 %v1457_v16, %s1346_s27 }
 0x2ad   : > { %619 = vrot.lane.b32.xlu0 %v1457_v16, %s1345_s26 }
 0x2c8   : > { %846 = vmax.xlane.f32.xlu1 %v845_v56 }
 0x2d9   : > { %861 = vrot.lane.b32.xlu1 %v1457_v16, %s1347_s28 }
 0x314   : > { %v602_v57 = vpop.xlane.xlu1 %601 }
 0x315   : > { %v606_v58 = vsub.f32 %v593_v39, %v602_v57 }
 0x316   : > { %v605_v59 = vpop.xlane.xlu0 %604 }
 0x317   : > { %v608_v60 = vmul.f32 1.442695, %v606_v58  ;;  %v607_v61 = vsub.f32 %v596_v42, %v605_v59 }
 0x319   : > { %1275 = vpow2.f32 %v608_v60  ;;  %v610_v62 = vmul.f32 1.442695, %v607_v61 }
 0x31b   : > { %1277 = vpow2.f32 %v610_v62 }
 0x31c   : > { %v723_v63 = vpop.xlane.xlu1 %722 }
 0x31d   : > { %v727_v0 = vsub.f32 %v714_v45, %v723_v63 }
 0x31f   : > { %v729_v1 = vmul.f32 1.442695, %v727_v0 }
 0x320   : > { %v726_v2 = vpop.xlane.xlu1 %725 }
 0x321   : > { %1279 = vpow2.f32 %v729_v1  ;;  %v728_v3 = vsub.f32 %v717_v48, %v726_v2 }
 0x323   : > { %v1276_v4 = vpop.eup %1275  ;;  %v731_v5 = vmul.f32 1.442695, %v728_v3 }
 0x324   : > { %v844_v7 = vpop.xlane.xlu0 %843  ;;  %v612_v8 = vsel %vm475_vm2, %v1276_v4, 0.0  ;;  %v741_v16 = vpop.permute.xlu1 %740 }
 0x325   : > { %v1278_v9 = vpop.eup %1277  ;;  %1281 = vpow2.f32 %v731_v5  ;;  %v848_v10 = vsub.f32 %v835_v51, %v844_v7  ;;  %613 = vadd.xlane.f32.xlu0 %v612_v8 }
 0x326   : > { %v615_v11 = vsel %vm475_vm2, %v1278_v9, 0.0  ;;  %v618_v12 = vpack.c.bf16 %v1278_v9, %v1276_v4 }
 0x327   : > { %v850_v13 = vmul.f32 1.442695, %v848_v10  ;;  %616 = vadd.xlane.f32.xlu1 %v615_v11 }
 0x328   : > { %v620_v14 = vpop.permute.xlu0 %619 }
 0x329   : > { %1283 = vpow2.f32 %v850_v13  ;;  %1178 = vmatpush3.bf16.msra.mxu0 %v620_v14 }
 0x32a   : > { %1189 = vmatprep.subr.bf16.mxu0 %v1343_v6 }
 0x32b   : > { %v1280_v15 = vpop.eup %1279 }
 0x32c   : > { %1180 = vmatmul.mubr.msk.bf16.vlgmr.msra.gmra.mrb[4].mxu0 %vm475_vm2, %v618_v12  ;;  %v733_v17 = vsel %vm475_vm2, %v1280_v15, 0.0 }
 0x32d   : > { %734 = vadd.xlane.f32.xlu0 %v733_v17  ;;  %1190 = vmatpush3.bf16.msra.mxu0 %v741_v16 }
 0x32e   : > { %1191 = vmatprep.mubr.msk.bf16.mxu0 %vm1344_vm0, %v1343_v6  ;;  %1201 = vmatprep.subr.bf16.mxu0 %v1343_v6 }
 0x32f   : > { %v1282_v18 = vpop.eup %1281 }
 0x330   : > { %v736_v19 = vsel %vm475_vm2, %v1282_v18, 0.0  ;;  %v739_v20 = vpack.c.bf16 %v1282_v18, %v1280_v15 }
 0x331   : > { %737 = vadd.xlane.f32.xlu0 %v736_v19 }
 0x333   : > { %v1284_v21 = vpop.eup %1283 }
 0x334   : > { %1192 = vmatmul.mubr.msk.bf16.vlgmr.msra.gmra.mrb[8].mxu0 %vm475_vm2, %v739_v20  ;;  %v854_v22 = vsel %vm475_vm2, %v1284_v21, 0.0 }
 0x335   : > { %855 = vadd.xlane.f32.xlu1 %v854_v22  ;;  %1203 = vmatprep.mubr.msk.bf16.mxu0 %vm1344_vm0, %v1343_v6  ;;  %v491_v6 = vsel %vm475_vm2, %v1464_v25, 0.0 }
 0x339   : > { %489 = vadd.xlane.f32.xlu1 %v488_v23 }
 0x355   : > { %v847_v26 = vpop.xlane.xlu1 %846 }
 0x356   : > { %v849_v27 = vsub.f32 %v838_v54, %v847_v26 }
 0x358   : > { %v852_v28 = vmul.f32 1.442695, %v849_v27 }
 0x359   : > { %v862_v29 = vpop.permute.xlu1 %861 }
 0x35a   : > { %1285 = vpow2.f32 %v852_v28  ;;  %1202 = vmatpush3.bf16.msra.mxu0 %v862_v29 }
 0x364   : > { %v1286_v30 = vpop.eup %1285 }
 0x365   : > { %v857_v31 = vsel %vm475_vm2, %v1286_v30, 0.0  ;;  %v860_v32 = vpack.c.bf16 %v1286_v30, %v1284_v21 }
 0x366   : > { %858 = vadd.xlane.f32.xlu0 %v857_v31 }
 0x367   : > { %1204 = vmatmul.mubr.msk.bf16.vlgmr.msra.gmra.mrb[12].mxu0 %vm475_vm2, %v860_v32 }
 0x36a   : > { %492 = vadd.xlane.f32.xlu0 %v491_v6 }
 0x3b2   : > { %v614_v33 = vpop.xlane.xlu0 %613 }
 0x3b3   : > { %1287 = vrcp.f32 %v614_v33 }
 0x3b4   : > { %v617_v24 = vpop.xlane.xlu1 %616 }
 0x3b5   : > { %1289 = vrcp.f32 %v617_v24 }
 0x3ba   : > { %v735_v34 = vpop.xlane.xlu0 %734 }
 0x3bb   : > { %1291 = vrcp.f32 %v735_v34 }
 0x3bd   : > { %v1288_v39 = vpop.eup %1287 }
 0x3be   : > { %v738_v36 = vpop.xlane.xlu0 %737 }
 0x3bf   : > { %1293 = vrcp.f32 %v738_v36  ;;  %v1290_v41 = vpop.eup %1289 }
 0x3c2   : > { %v856_v55 = vpop.xlane.xlu1 %855 }
 0x3c3   : > { %1295 = vrcp.f32 %v856_v55 }
 0x3c5   : > { %v1292_v47 = vpop.eup %1291 }
 0x3c6   : > { %v490_v2 = vpop.xlane.xlu1 %489 }
 0x3c9   : > { %v1294_v49 = vpop.eup %1293 }
 0x3cd   : > { %v1296_v58 = vpop.eup %1295 }
 0x3f3   : > { %v859_v56 = vpop.xlane.xlu0 %858 }
 0x3f4   : > { %1297 = vrcp.f32 %v859_v56 }
 0x3f5   : > { %1299 = vrcp.f32 %v490_v2 }
 0x3f7   : > { %v493_v3 = vpop.xlane.xlu0 %492 }
 0x3f8   : > { %1301 = vrcp.f32 %v493_v3 }
 0x3fe   : > { %v1298_v60 = vpop.eup %1297 }
 0x3ff   : > { %v659_v38 = vpop.f32.mrb[4].mxu0  ;;  %v1300_v5 = vpop.eup %1299 }
 0x400   : > { %v1181_v40 = vpop.f32.mrb[5].mxu0  ;;  %v668_v43 = vmul.f32 %v1288_v39, %v659_v38  ;;  %v547_v13 = vmul.f32 %v1300_v5, %v1483_v35 }
 0x401   : > { %v662_v42 = vpop.f32.mrb[6].mxu0 }
 0x402   : > { %v669_v44 = vmul.f32 %v1290_v41, %v662_v42  ;;  %v1182_v45 = vpop.f32.mrb[7].mxu0  ;;  %v1302_v8 = vpop.eup %1301 }
 0x403   : > { %v548_v14 = vmul.f32 %v1302_v8, %v1485_v37 }
 0x404   : > { %v1253_v46 = vpack.i.bf16 %v669_v44, %v668_v43 }
 0x406   : > { %1254 = vrot.lane.b32.xlu1 %v1253_v46, %s1347_s28 }
 0x407   : > { %v780_v25 = vpop.f32.mrb[8].mxu0 }
 0x408   : > { %v1193_v48 = vpop.f32.mrb[9].mxu0  ;;  %v789_v51 = vmul.f32 %v1292_v47, %v780_v25 }
 0x409   : > { %v783_v50 = vpop.f32.mrb[10].mxu0 }
 0x40a   : > { %v790_v52 = vmul.f32 %v1294_v49, %v783_v50  ;;  %v1194_v53 = vpop.f32.mrb[11].mxu0 }
 0x40c   : > { %v1258_v54 = vpack.i.bf16 %v790_v52, %v789_v51 }
 0x40e   : > { %1259 = vrot.lane.b32.xlu0 %v1258_v54, %s1346_s27 }
 0x43a   : > { %v901_v57 = vpop.f32.mrb[12].mxu0 }
 0x43b   : > { %v1205_v59 = vpop.f32.mrb[13].mxu0  ;;  %v910_v62 = vmul.f32 %v1296_v58, %v901_v57 }
 0x43c   : > { %v904_v61 = vpop.f32.mrb[14].mxu0 }
 0x43d   : > { %v911_v63 = vmul.f32 %v1298_v60, %v904_v61  ;;  %v1206_v0 = vpop.f32.mrb[15].mxu0 }
 0x43f   : > { %v1263_v1 = vpack.i.bf16 %v911_v63, %v910_v62 }
 0x441   : > { %1264 = vrot.lane.b32.xlu1 %v1263_v1, %s1345_s26 }
 0x478   : > { %v1255_v4 = vpop.permute.xlu1 %1254 }
 0x479   : > { %v1257_v9 = vunpack.i.h.bf16 %v1255_v4  ;;  %v1256_v10 = vunpack.i.l.bf16 %v1255_v4 }
 0x47b   : > { %v937_v16 = vsel %vm427_vm1, %v548_v14, %v1257_v9  ;;  %v936_v17 = vsel %vm427_vm1, %v547_v13, %v1256_v10 }
 0x480   : > { %v1260_v7 = vpop.permute.xlu0 %1259 }
 0x481   : > { %v1262_v11 = vunpack.i.h.bf16 %v1260_v7  ;;  %v1261_v12 = vunpack.i.l.bf16 %v1260_v7 }
 0x483   : > { %v940_v20 = vsel %vm938_vm3, %v937_v16, %v1262_v11  ;;  %v939_v21 = vsel %vm938_vm3, %v936_v17, %v1261_v12 }
 0x4b3   : > { %v1265_v15 = vpop.permute.xlu1 %1264 }
 0x4b4   : > { %v1267_v18 = vunpack.i.h.bf16 %v1265_v15  ;;  %v1266_v19 = vunpack.i.l.bf16 %v1265_v15 }
 0x4b6   : > { %v943_v22 = vsel %vm941_vm4, %v940_v20, %v1267_v18  ;;  %v942_v35 = vsel %vm941_vm4, %v939_v21, %v1266_v19 }
 0x4b7   : > { %v1141_v23 = vpack.c.bf16 %v943_v22, %v942_v35 }
 0x4b9   : > { %1142 = vst [vmem:[%s408_s6] sm:$0xff] %v1141_v23  }
 0x4ba PF: > { %s13_s16 = sadd.s32 1, %s1341_s16   ;;  %s1550_s12 = smov %s1329_s13 }
 0x4bb   : > { %p10_p10 = scmp.ge.s32.totalorder %s13_s16, 4   ;;  %s1551_s13 = smov %s1407_s21 }
 0x4bc   : > { %s1552_s14 = smov %s1337_s15  ;;  %s1553_s15 = smov %s1555_s17 }
 0x4bd   :  { %12 = sbr.rel (!%p10_p10) target bundleno = 3 (0x3), region = 206 }

// kernel: protein_encoder_forward.13
= control target key start
LH: loop header
LB: loop body
LE: loop exit
PB: predicated region body
PF: predicated region fallthrough
CT: control target
= control target key end

     0   :  { %vm19_vm0 = vcmask 1041408   ;;  %s134_s0 = inlined_call_operand.vmem [shape: bf16[2,128], index: 0, kind: input, shape index: {}]   ;;  %s135_s1 = inlined_call_operand.vmem [shape: f32[1,128], index: 1, kind: input, shape index: {}]   ;;  %s136_s2 = inlined_call_operand.vmem [shape: f32[1,128], index: 2, kind: input, shape index: {}]   ;;  %s137_s3 = inlined_call_operand.hbm [shape: f32[2,128], index: 3, kind: output, shape index: {}]  }
   0x1   :  { %v15_v0 = vld [vmem:[%s134_s0] sm:$0x1] }
   0x2   :  { %8 = vsyncpa [#allocation3], 0  ;;  %v16_v1 = vunpack.c.l.bf16 %v15_v0  ;;  %v63_v12 = vld [vmem:[%s135_s1] ss:$0 sm:$0xff]  ;;  %s92_s17 = smov [#allocation2]  }
   0x3   :  { %v64_v14 = vld [vmem:[%s136_s2] ss:$0 sm:$0xff]  ;;  %s55_s18 = sshll.u32 %s92_s17, 4  ;;  %s56_s18 = int_to_ptr.vmem [resolvable:$true] %s55_s18 }
   0x4   :  { %v20_v2 = vsel %vm19_vm0, %v16_v1, 0.0  ;;  %s68_s19 = scalar_lea.vmem %s56_s18, 32  ;;  %p73_p1 = scmp.lt.s32.totalorder %s56_s18, %s56_s18 }
   0x5   :  { %21 = vadd.xlane.f32.xlu0 %v20_v2  ;;  %p69_p0 = scmp.ne.s32.totalorder %s56_s18, %s68_s19  ;;  %p74_p2 = scmp.lt.s32.totalorder %s68_s19, %s68_s19 }
   0x7   :  { %p75_p3 = por %p74_p2, %p73_p1 }
   0x9   :  { %p76_p4 = pnand %p75_p3, %p69_p0 }
  0x92   :  { %v22_v3 = vpop.xlane.xlu0 %21 }
  0x93   :  { %v24_v4 = vmul.f32 0.0078125, %v22_v3 }
  0x95   :  { %v25_v5 = vsub.f32 %v16_v1, %v24_v4 }
  0x97   :  { %v26_v6 = vmul.f32 %v25_v5, %v25_v5 }
  0x99   :  { %v27_v7 = vsel %vm19_vm0, %v26_v6, 0.0 }
  0x9a   :  { %28 = vadd.xlane.f32.xlu0 %v27_v7 }
 0x127   :  { %v29_v8 = vpop.xlane.xlu0 %28 }
 0x128   :  { %v30_v9 = vmul.f32 0.0078125, %v29_v8 }
 0x12a   :  { %v31_v10 = vadd.f32 1e-05, %v30_v9 }
 0x12c   :  { %66 = vrsqrt.f32 %v31_v10 }
 0x136   :  { %v67_v11 = vpop.eup %66 }
 0x137   :  { %v33_v13 = vmul.f32 %v67_v11, %v25_v5 }
 0x139   :  { %v40_v15 = vmul.f32 %v63_v12, %v33_v13 }
 0x13b   :  { %v47_v16 = vadd.f32 %v64_v14, %v40_v15 }
 0x13d   :  { %48 = vst [vmem:[#allocation2] sm:$0x3] %v47_v16 }
 0x13e   :  { %79 = shalt.err (!%p76_p4)
}
 0x13f   :  { %s80_s21 = scalar_lea.hbm %s137_s3, 32 }
 0x140   :  { %p81_p5 = scmp.ne.s32.totalorder %s137_s3, %s80_s21  ;;  %p84_p6 = scmp.lt.u32.totalorder %s80_s21, %s137_s3 }
 0x142   :  { %p86_p7 = pnand %p84_p6, %p81_p5 }
 0x144   :  { %89 = shalt.err (!%p86_p7)
}
 0x145   :  { %58 = dma.vmem_to_hbm [thread:$0]  %s56_s18, 32, %s137_s3, [#allocation3]  }
 0x146   :  { %90 = dma.done.wait [#allocation3], 32  }
 0x147   :  { %91 = vsyncadd [#allocation3], 4294967264 }
 0x148   :  { %62 = vsyncpa [#allocation3], 1 }

// kernel: protein_encoder_forward.9
= control target key start
LH: loop header
LB: loop body
LE: loop exit
PB: predicated region body
PF: predicated region fallthrough
CT: control target
= control target key end

     0   :  { %s1994_s2 = inlined_call_operand.vmem [shape: bf16[128,128], index: 2, kind: input, shape index: {}]   ;;  %s1995_s1 = inlined_call_operand.vmem [shape: bf16[32,128], index: 1, kind: input, shape index: {}]   ;;  %s1996_s0 = inlined_call_operand.vmem [shape: bf16[32,128], index: 0, kind: input, shape index: {}]   ;;  %s1997_s3 = inlined_call_operand.vmem [shape: f32[1,128], index: 3, kind: input, shape index: {}]   ;;  %s1998_s6 = inlined_call_operand.vmem [shape: bf16[128,512], index: 6, kind: input, shape index: {}]   ;;  %s1999_s4 = inlined_call_operand.vmem [shape: f32[1,128], index: 4, kind: input, shape index: {}]   ;;  %s2000_s5 = inlined_call_operand.vmem [shape: f32[1,128], index: 5, kind: input, shape index: {}]   ;;  %s2001_s8 = inlined_call_operand.vmem [shape: bf16[512,128], index: 8, kind: input, shape index: {}]   ;;  %s2002_s7 = inlined_call_operand.vmem [shape: f32[1,512], index: 7, kind: input, shape index: {}]   ;;  %s2003_s9 = inlined_call_operand.vmem [shape: f32[1,128], index: 9, kind: input, shape index: {}]   ;;  %s2004_s10 = inlined_call_operand.vmem [shape: bf16[32,128], index: 10, kind: output, shape index: {}]  }
   0x1   :  { %v1323_v0 = vld [vmem:[%s1994_s2] sm:$0xff]   ;;  %v1324_v1 = vld [vmem:[%s1994_s2 + $0x8] sm:$0xff]   ;;  %v1325_v2 = vld [vmem:[%s1994_s2 + $0x10] sm:$0xff]  }
   0x2   :  { %1286 = vmatprep.subr.bf16.mxu0 %v1323_v0  ;;  %v1326_v3 = vld [vmem:[%s1994_s2 + $0x18] sm:$0xff]   ;;  %v1331_v4 = vld [vmem:[%s1995_s1] sm:$0xff]   ;;  %v1328_v6 = vld [vmem:[%s1994_s2 + $0x28] sm:$0xff]  }
   0x3   :  { %1287 = vmatpush3.bf16.msra.mxu0 %v1323_v0  ;;  %1302 = vmatprep.mubr.bf16.mxu0 %v1331_v4  ;;  %v1327_v5 = vld [vmem:[%s1994_s2 + $0x20] sm:$0xff]   ;;  %v1329_v7 = vld [vmem:[%s1994_s2 + $0x30] sm:$0xff]   ;;  %v1330_v8 = vld [vmem:[%s1994_s2 + $0x38] sm:$0xff]  }
   0x4   :  { %1288 = vmatprep.subr.bf16.mxu0 %v1324_v1  ;;  %v1332_v9 = vld [vmem:[%s1995_s1 + $0x8] sm:$0xff]   ;;  %v1201_v11 = vld [vmem:[%s1996_s0] sm:$0xff]  }
   0x5   :  { %v1218_v10 = vld [vmem:[%s1996_s0 + $0x8] sm:$0xff]   ;;  %v1114_v12 = vld [vmem:[%s1997_s3] ss:$0 sm:$0xff]  ;;  %v1202_v15 = vunpack.c.l.bf16 %v1201_v11  ;;  %v1203_v26 = vunpack.c.h.bf16 %v1201_v11  ;;  %v1333_v29 = vld [vmem:[%s1998_s6 + $0x4] ss:$16 sps:$4 sm:$0xff]   ;;  %v1453_v11 = vmov 0  }
   0x6   :  { %v1206_v13 = vunpack.c.l.bf16 %v1218_v10  ;;  %v1207_v22 = vunpack.c.h.bf16 %v1218_v10  ;;  %v1335_v30 = vld [vmem:[%s1998_s6 + $0x8] ss:$16 sps:$4 sm:$0xff]   ;;  %467 = vmatprep.subr.bf16.mxu1 %v1333_v29  ;;  %v1337_v31 = vld [vmem:[%s1998_s6 + $0xc] ss:$16 sps:$4 sm:$0xff]   ;;  %v1338_v32 = vld [vmem:[%s1998_s6] ss:$16 sps:$4 sm:$0xff]   ;;  %499 = vmatprep.mubr.bf16.mxu1 %v1453_v11 }
   0x7   :  { %1289 = vmatpush3.bf16.msra.mxu0 %v1324_v1  ;;  %v1339_v33 = vld [vmem:[%s1998_s6 + $0x24] ss:$16 sps:$4 sm:$0xff]   ;;  %468 = vmatpush1.bf16.msra.mxu1 %v1338_v32  ;;  %v1341_v34 = vld [vmem:[%s1998_s6 + $0x28] ss:$16 sps:$4 sm:$0xff]   ;;  %v1343_v35 = vld [vmem:[%s1998_s6 + $0x2c] ss:$16 sps:$4 sm:$0xff]  }
   0x8   :  { %1290 = vmatprep.subr.bf16.mxu0 %v1325_v2  ;;  %469 = vmatprep.subr.bf16.mxu1 %v1339_v33  ;;  %v1344_v52 = vld [vmem:[%s1998_s6 + $0x20] ss:$16 sps:$4 sm:$0xff]   ;;  %v1345_v53 = vld [vmem:[%s1998_s6 + $0x44] ss:$16 sps:$4 sm:$0xff]   ;;  %v1349_v54 = vld [vmem:[%s1998_s6 + $0x4c] ss:$16 sps:$4 sm:$0xff]  }
   0x9   :  { %v1347_v55 = vld [vmem:[%s1998_s6 + $0x48] ss:$16 sps:$4 sm:$0xff]   ;;  %v1350_v56 = vld [vmem:[%s1998_s6 + $0x40] ss:$16 sps:$4 sm:$0xff]   ;;  %v1351_v57 = vld [vmem:[%s1998_s6 + $0x64] ss:$16 sps:$4 sm:$0xff]  }
   0xa   :  { %v1355_v58 = vld [vmem:[%s1998_s6 + $0x6c] ss:$16 sps:$4 sm:$0xff]   ;;  %v1353_v59 = vld [vmem:[%s1998_s6 + $0x68] ss:$16 sps:$4 sm:$0xff]   ;;  %v1356_v60 = vld [vmem:[%s1998_s6 + $0x60] ss:$16 sps:$4 sm:$0xff]  }
   0xb   :  { %1291 = vmatpush3.bf16.msra.mxu0 %v1325_v2  ;;  %470 = vmatpush1.bf16.msra.mxu1 %v1344_v52  ;;  %v1357_v61 = vld [vmem:[%s1998_s6 + $0x84] ss:$16 sps:$4 sm:$0xff]   ;;  %v1361_v62 = vld [vmem:[%s1998_s6 + $0x8c] ss:$16 sps:$4 sm:$0xff]   ;;  %v1359_v63 = vld [vmem:[%s1998_s6 + $0x88] ss:$16 sps:$4 sm:$0xff]  }
   0xc   :  { %1292 = vmatprep.subr.bf16.mxu0 %v1326_v3  ;;  %471 = vmatprep.subr.bf16.mxu1 %v1345_v53  ;;  %v1362_v0 = vld [vmem:[%s1998_s6 + $0x80] ss:$16 sps:$4 sm:$0xff]   ;;  %v1363_v1 = vld [vmem:[%s1998_s6 + $0xa4] ss:$16 sps:$4 sm:$0xff]   ;;  %v1367_v2 = vld [vmem:[%s1998_s6 + $0xac] ss:$16 sps:$4 sm:$0xff]  }
   0xd   :  { %v1368_v4 = vld [vmem:[%s1998_s6 + $0xa0] ss:$16 sps:$4 sm:$0xff]   ;;  %v1379_v10 = vld [vmem:[%s1998_s6 + $0xec] ss:$16 sps:$4 sm:$0xff]  }
   0xe   :  { %v1125_v32 = vld [vmem:[%s1999_s4] ss:$0 sm:$0xff] }
   0xf   :  { %1293 = vmatpush3.bf16.msra.mxu0 %v1326_v3  ;;  %472 = vmatpush1.bf16.msra.mxu1 %v1350_v56  ;;  %v1365_v3 = vld [vmem:[%s1998_s6 + $0xa8] ss:$16 sps:$4 sm:$0xff]   ;;  %v1381_v52 = vld [vmem:[%s2001_s8 + $0x40] sm:$0xff]  }
  0x10   :  { %1294 = vmatprep.subr.bf16.mxu0 %v1327_v5  ;;  %473 = vmatprep.subr.bf16.mxu1 %v1351_v57  ;;  %v1698_v53 = vld [vmem:[%s2001_s8 + $0x80] sm:$0xff]   ;;  %v1710_v56 = vld [vmem:[%s2001_s8 + $0xc8] sm:$0xff]  }
  0x11   :  { %v1716_v57 = vld [vmem:[%s2001_s8 + $0x88] sm:$0xff]  }
  0x13   :  { %1295 = vmatpush3.bf16.msra.mxu0 %v1327_v5  ;;  %474 = vmatpush1.bf16.msra.mxu1 %v1356_v60  ;;  %v1369_v5 = vld [vmem:[%s1998_s6 + $0xc4] ss:$16 sps:$4 sm:$0xff]  }
  0x14   :  { %1296 = vmatprep.subr.bf16.mxu0 %v1328_v6  ;;  %475 = vmatprep.subr.bf16.mxu1 %v1357_v61  ;;  %v1728_v60 = vld [vmem:[%s2001_s8 + $0xd0] sm:$0xff]  }
  0x15   :  { %v1733_v61 = vld [vmem:[%s2001_s8 + $0x90] sm:$0xff]  }
  0x17   :  { %1297 = vmatpush3.bf16.msra.mxu0 %v1328_v6  ;;  %476 = vmatpush1.bf16.msra.mxu1 %v1362_v0  ;;  %v1373_v6 = vld [vmem:[%s1998_s6 + $0xcc] ss:$16 sps:$4 sm:$0xff]  }
  0x18   :  { %1298 = vmatprep.subr.bf16.mxu0 %v1329_v7  ;;  %477 = vmatprep.subr.bf16.mxu1 %v1363_v1  ;;  %v1746_v0 = vld [vmem:[%s2001_s8 + $0xd8] sm:$0xff]  }
  0x19   :  { %v1751_v1 = vld [vmem:[%s2001_s8 + $0x98] sm:$0xff]  }
  0x1b   :  { %1299 = vmatpush3.bf16.msra.mxu0 %v1329_v7  ;;  %478 = vmatpush1.bf16.msra.mxu1 %v1368_v4  ;;  %v1371_v7 = vld [vmem:[%s1998_s6 + $0xc8] ss:$16 sps:$4 sm:$0xff]   ;;  %v1764_v4 = vld [vmem:[%s2001_s8 + $0xe0] sm:$0xff]  }
  0x1c   :  { %1300 = vmatprep.subr.bf16.mxu0 %v1330_v8  ;;  %479 = vmatprep.subr.bf16.mxu1 %v1369_v5  ;;  %v1769_v5 = vld [vmem:[%s2001_s8 + $0xa0] sm:$0xff]  }
  0x1f   :  { %1301 = vmatpush3.bf16.msra.mxu0 %v1330_v8  ;;  %v1374_v8 = vld [vmem:[%s1998_s6 + $0xc0] ss:$16 sps:$4 sm:$0xff]  }
  0x20   :  { %520 = vmatprep.subr.bf16.mxu0 %v1337_v31  ;;  %480 = vmatpush1.bf16.msra.mxu1 %v1374_v8  ;;  %v1782_v8 = vld [vmem:[%s2001_s8 + $0xe8] sm:$0xff]  }
  0x22   :  { %1303 = vmatmul.mubr.bf16.vlgmr.msra.gmra.mrb[0].mxu0 %v1332_v9  ;;  %v1375_v9 = vld [vmem:[%s1998_s6 + $0xe4] ss:$16 sps:$4 sm:$0xff]  }
  0x23   :  { %521 = vmatpush1.bf16.msra.mxu0 %v1335_v30  ;;  %552 = vmatprep.mubr.bf16.mxu0 %v1453_v11 }
  0x24   :  { %522 = vmatprep.subr.bf16.mxu0 %v1343_v35  ;;  %481 = vmatprep.subr.bf16.mxu1 %v1375_v9  ;;  %v1787_v9 = vld [vmem:[%s2001_s8 + $0xa8] sm:$0xff]  }
  0x27   :  { %523 = vmatpush1.bf16.msra.mxu0 %v1341_v34 }
  0x28   :  { %524 = vmatprep.subr.bf16.mxu0 %v1349_v54  ;;  %v1385_v54 = vld [vmem:[%s2001_s8 + $0x48] sm:$0xff]  }
  0x2b   :  { %525 = vmatpush1.bf16.msra.mxu0 %v1347_v55  ;;  %v1386_v55 = vld [vmem:[%s2001_s8 + $0x8] sm:$0xff]  }
  0x2c   :  { %526 = vmatprep.subr.bf16.mxu0 %v1355_v58  ;;  %v1389_v58 = vld [vmem:[%s2001_s8 + $0x50] sm:$0xff]  }
  0x2f   :  { %527 = vmatpush1.bf16.msra.mxu0 %v1353_v59  ;;  %v1390_v59 = vld [vmem:[%s2001_s8 + $0x10] sm:$0xff]  }
  0x30   :  { %528 = vmatprep.subr.bf16.mxu0 %v1361_v62  ;;  %v1393_v62 = vld [vmem:[%s2001_s8 + $0x58] sm:$0xff]  }
  0x33   :  { %529 = vmatpush1.bf16.msra.mxu0 %v1359_v63  ;;  %v1394_v63 = vld [vmem:[%s2001_s8 + $0x18] sm:$0xff]  }
  0x34   :  { %530 = vmatprep.subr.bf16.mxu0 %v1367_v2  ;;  %v1397_v2 = vld [vmem:[%s2001_s8 + $0x60] sm:$0xff]  }
  0x37   :  { %531 = vmatpush1.bf16.msra.mxu0 %v1365_v3  ;;  %v1398_v3 = vld [vmem:[%s2001_s8 + $0x20] sm:$0xff]  }
  0x38   :  { %532 = vmatprep.subr.bf16.mxu0 %v1373_v6  ;;  %v1401_v6 = vld [vmem:[%s2001_s8 + $0x68] sm:$0xff]  }
  0x3b   :  { %533 = vmatpush1.bf16.msra.mxu0 %v1371_v7  ;;  %v1402_v7 = vld [vmem:[%s2001_s8 + $0x28] sm:$0xff]  }
  0x3c   :  { %534 = vmatprep.subr.bf16.mxu0 %v1379_v10  ;;  %v1405_v10 = vld [vmem:[%s2001_s8 + $0x70] sm:$0xff]  }
  0xf5   :  { %v1304_v14 = vpop.f32.mrb[0].mxu0 }
  0xf6   :  { %v166_v16 = vadd.f32 %v1304_v14, %v1114_v12  ;;  %v157_v17 = vpop.f32.mrb[1].mxu0 }
  0xf7   :  { %v158_v18 = vadd.f32 %v1114_v12, %v157_v17  ;;  %v1305_v19 = vpop.f32.mrb[2].mxu0 }
  0xf8   :  { %v1548_v20 = vadd.f32 %v1206_v13, %v166_v16  ;;  %v169_v21 = vadd.f32 %v1305_v19, %v1114_v12  ;;  %v160_v23 = vpop.f32.mrb[3].mxu0  ;;  %v1380_v13 = vld [vmem:[%s1998_s6 + $0xe0] ss:$16 sps:$4 sm:$0xff]  }
  0xf9   :  { %v1550_v24 = vadd.f32 %v1202_v15, %v158_v18  ;;  %v161_v25 = vadd.f32 %v1114_v12, %v160_v23  ;;  %v1377_v12 = vld [vmem:[%s1998_s6 + $0xe8] ss:$16 sps:$4 sm:$0xff]   ;;  %482 = vmatpush1.bf16.msra.mxu1 %v1380_v13  ;;  %v1805_v13 = vld [vmem:[%s2001_s8 + $0xb0] sm:$0xff]  }
  0xfa   :  { %190 = vadd.xlane.f32.xlu1 %v1548_v20  ;;  %v1554_v27 = vadd.f32 %v1207_v22, %v169_v21  ;;  %535 = vmatpush1.bf16.msra.mxu0 %v1377_v12  ;;  %v1800_v12 = vld [vmem:[%s2001_s8 + $0xf0] sm:$0xff]  }
  0xfb   :  { %186 = vadd.xlane.f32.xlu0 %v1550_v24  ;;  %v1556_v28 = vadd.f32 %v1203_v26, %v161_v25  ;;  %1230 = vmatprep.subr.bf16.mxu1 %v1381_v52 }
  0xfe   :  { %192 = vadd.xlane.f32.xlu1 %v1554_v27 }
  0xff   :  { %188 = vadd.xlane.f32.xlu0 %v1556_v28 }
 0x187   :  { %v191_v36 = vpop.xlane.xlu1 %190 }
 0x188   :  { %v187_v37 = vpop.xlane.xlu0 %186  ;;  %v197_v38 = vmul.f32 0.0078125, %v191_v36 }
 0x189   :  { %v195_v39 = vmul.f32 0.0078125, %v187_v37  ;;  %v1126_v37 = vld [vmem:[%s2000_s5] ss:$0 sm:$0xff] }
 0x18a   :  { %v1585_v43 = vsub.f32 %v1548_v20, %v197_v38 }
 0x18b   :  { %v1582_v40 = vsub.f32 %v1550_v24, %v195_v39  ;;  %v193_v41 = vpop.xlane.xlu1 %192 }
 0x18c   :  { %v189_v42 = vpop.xlane.xlu0 %188  ;;  %v198_v44 = vmul.f32 0.0078125, %v193_v41  ;;  %v205_v49 = vmul.f32 %v1585_v43, %v1585_v43 }
 0x18d   :  { %v196_v45 = vmul.f32 0.0078125, %v189_v42  ;;  %v203_v46 = vmul.f32 %v1582_v40, %v1582_v40 }
 0x18e   :  { %v1593_v48 = vsub.f32 %v1554_v27, %v198_v44 }
 0x18f   :  { %v1590_v47 = vsub.f32 %v1556_v28, %v196_v45  ;;  %207 = vadd.xlane.f32.xlu0 %v203_v46 }
 0x190   :  { %v206_v51 = vmul.f32 %v1593_v48, %v1593_v48 }
 0x191   :  { %v204_v50 = vmul.f32 %v1590_v47, %v1590_v47 }
 0x193   :  { %211 = vadd.xlane.f32.xlu0 %v205_v49  ;;  %209 = vadd.xlane.f32.xlu1 %v204_v50 }
 0x197   :  { %213 = vadd.xlane.f32.xlu1 %v206_v51 }
 0x21c   :  { %v208_v14 = vpop.xlane.xlu0 %207 }
 0x21d   :  { %v215_v15 = vmul.f32 0.0078125, %v208_v14  ;;  %v1409_v14 = vld [vmem:[%s2001_s8 + $0x78] sm:$0xff]  }
 0x21f   :  { %v219_v16 = vadd.f32 1e-05, %v215_v15  ;;  %v1410_v15 = vld [vmem:[%s2001_s8 + $0x38] sm:$0xff]  }
 0x220   :  { %v210_v17 = vpop.xlane.xlu1 %209  ;;  %v212_v18 = vpop.xlane.xlu0 %211 }
 0x221   :  { %1413 = vrsqrt.f32 %v219_v16  ;;  %v216_v19 = vmul.f32 0.0078125, %v210_v17  ;;  %v217_v21 = vmul.f32 0.0078125, %v212_v18  ;;  %v1818_v16 = vld [vmem:[%s2001_s8 + $0xf8] sm:$0xff]   ;;  %v287_v18 = vlaneseq }
 0x222   :  { %v1823_v17 = vld [vmem:[%s2001_s8 + $0xb8] sm:$0xff]  }
 0x223   :  { %v220_v22 = vadd.f32 1e-05, %v216_v19  ;;  %v221_v23 = vadd.f32 1e-05, %v217_v21  ;;  %v288_v19 = vshrl.u32 %v287_v18, 7 }
 0x224   :  { %v214_v25 = vpop.xlane.xlu1 %213 }
 0x225   :  { %1415 = vrsqrt.f32 %v220_v22  ;;  %v218_v26 = vmul.f32 0.0078125, %v214_v25  ;;  %v289_v21 = vsub.s32 0, %v288_v19  ;;  %v297_v22 = vsub.s32 2, %v288_v19 }
 0x226   :  { %1417 = vrsqrt.f32 %v221_v23  ;;  %v285_v23 = vld [vmem:[%s2002_s7] sm:$0xf]  ;;  %v293_v25 = vsub.s32 1, %v288_v19 }
 0x227   :  { %v222_v29 = vadd.f32 1e-05, %v218_v26  ;;  %v301_v26 = vsub.s32 3, %v288_v19 }
 0x229   :  { %1419 = vrsqrt.f32 %v222_v29  ;;  %v1830_v29 = vrot.slane %v285_v23, %v289_v21 }
 0x22b   :  { %v1414_v30 = vpop.eup %1413 }
 0x22c   :  { %v227_v31 = vmul.f32 %v1414_v30, %v1582_v40  ;;  %v1832_v30 = vrot.slane %v285_v23, %v297_v22 }
 0x22e   :  { %v237_v35 = vmul.f32 %v1125_v32, %v227_v31  ;;  %v1834_v31 = vrot.slane %v285_v23, %v293_v25 }
 0x22f   :  { %v1416_v33 = vpop.eup %1415 }
 0x230   :  { %v228_v34 = vmul.f32 %v1416_v33, %v1590_v47  ;;  %v1418_v36 = vpop.eup %1417  ;;  %v247_v41 = vadd.f32 %v1126_v37, %v237_v35 }
 0x231   :  { %v229_v44 = vmul.f32 %v1418_v36, %v1585_v43  ;;  %v1382_v43 = vld [vmem:[%s2001_s8] sm:$0xff]  }
 0x232   :  { %v238_v38 = vmul.f32 %v1125_v32, %v228_v34 }
 0x233   :  { %v1420_v39 = vpop.eup %1419  ;;  %v239_v49 = vmul.f32 %v1125_v32, %v229_v44 }
 0x234   :  { %v248_v42 = vadd.f32 %v1126_v37, %v238_v38  ;;  %v230_v40 = vmul.f32 %v1420_v39, %v1593_v48  ;;  %v1383_v48 = vld [vmem:[%s2001_s8 + $0xc0] sm:$0xff]  }
 0x235   :  { %v249_v50 = vadd.f32 %v1126_v37, %v239_v49  ;;  %1258 = vmatprep.subr.bf16.mxu0 %v1383_v48 }
 0x236   :  { %v251_v45 = vpack.c.bf16 %v248_v42, %v247_v41  ;;  %v240_v46 = vmul.f32 %v1125_v32, %v230_v40  ;;  %v1836_v32 = vrot.slane %v285_v23, %v301_v26 }
 0x238   :  { %500 = vmatmul.mubr.bf16.vlgmr.msra.gmra.mrb[0].mxu1 %v251_v45  ;;  %553 = vmatmul.mubr.bf16.vlgmr.msra.gmra.mrb[4].mxu0 %v251_v45  ;;  %v250_v47 = vadd.f32 %v1126_v37, %v240_v46 }
 0x239   :  { %509 = vmatprep.mubr.bf16.mxu1 %v1453_v11  ;;  %562 = vmatprep.mubr.bf16.mxu0 %v1453_v11  ;;  %v1406_v11 = vld [vmem:[%s2001_s8 + $0x30] sm:$0xff]  }
 0x23a   :  { %v252_v51 = vpack.c.bf16 %v250_v47, %v249_v50  ;;  %1231 = vmatpush3.bf16.msra.mxu1 %v1382_v43  ;;  %1259 = vmatpush3.bf16.msra.mxu0 %v1698_v53 }
 0x23b   :  { %1232 = vmatprep.subr.bf16.mxu1 %v1385_v54  ;;  %1260 = vmatprep.subr.bf16.mxu0 %v1710_v56 }
 0x23e   :  { %1233 = vmatpush3.bf16.msra.mxu1 %v1386_v55  ;;  %1261 = vmatpush3.bf16.msra.mxu0 %v1716_v57 }
 0x23f   :  { %1234 = vmatprep.subr.bf16.mxu1 %v1389_v58  ;;  %1262 = vmatprep.subr.bf16.mxu0 %v1728_v60 }
 0x240   :  { %510 = vmatmul.mubr.bf16.gmra.mrb[4].mxu1 %v252_v51  ;;  %563 = vmatmul.mubr.bf16.gmra.mrb[8].mxu0 %v252_v51 }
 0x242   :  { %1235 = vmatpush3.bf16.msra.mxu1 %v1390_v59  ;;  %1263 = vmatpush3.bf16.msra.mxu0 %v1733_v61 }
 0x243   :  { %1236 = vmatprep.subr.bf16.mxu1 %v1393_v62  ;;  %1264 = vmatprep.subr.bf16.mxu0 %v1746_v0 }
 0x246   :  { %1237 = vmatpush3.bf16.msra.mxu1 %v1394_v63  ;;  %1265 = vmatpush3.bf16.msra.mxu0 %v1751_v1 }
 0x247   :  { %1238 = vmatprep.subr.bf16.mxu1 %v1397_v2  ;;  %1266 = vmatprep.subr.bf16.mxu0 %v1764_v4 }
 0x24a   :  { %1239 = vmatpush3.bf16.msra.mxu1 %v1398_v3  ;;  %1267 = vmatpush3.bf16.msra.mxu0 %v1769_v5 }
 0x24b   :  { %1240 = vmatprep.subr.bf16.mxu1 %v1401_v6  ;;  %1268 = vmatprep.subr.bf16.mxu0 %v1782_v8 }
 0x24e   :  { %1241 = vmatpush3.bf16.msra.mxu1 %v1402_v7  ;;  %1269 = vmatpush3.bf16.msra.mxu0 %v1787_v9 }
 0x24f   :  { %1242 = vmatprep.subr.bf16.mxu1 %v1405_v10  ;;  %1270 = vmatprep.subr.bf16.mxu0 %v1800_v12 }
 0x252   :  { %1243 = vmatpush3.bf16.msra.mxu1 %v1406_v11  ;;  %1271 = vmatpush3.bf16.msra.mxu0 %v1805_v13 }
 0x253   :  { %1244 = vmatprep.subr.bf16.mxu1 %v1409_v14  ;;  %1272 = vmatprep.subr.bf16.mxu0 %v1818_v16 }
 0x256   :  { %1245 = vmatpush3.bf16.msra.mxu1 %v1410_v15  ;;  %1273 = vmatpush3.bf16.msra.mxu0 %v1823_v17 }
 0x257   :  { %1306 = vmatprep.subr.bf16.mxu1 %v1383_v48 }
 0x30b   :  { %v501_v33 = vpop.f32.mrb[0].mxu1  ;;  %v554_v34 = vpop.f32.mrb[4].mxu0 }
 0x30c   :  { %v1839_v35 = vadd.f32 %v501_v33, %v1830_v29  ;;  %v1842_v36 = vadd.f32 %v554_v34, %v1832_v30  ;;  %v503_v37 = vpop.f32.mrb[1].mxu1  ;;  %v556_v38 = vpop.f32.mrb[5].mxu0 }
 0x30d   :  { %v1845_v39 = vadd.f32 %v503_v37, %v1834_v31  ;;  %v1848_v41 = vadd.f32 %v556_v38, %v1836_v32  ;;  %v505_v42 = vpop.f32.mrb[2].mxu1  ;;  %v558_v44 = vpop.f32.mrb[6].mxu0 }
 0x30e   :  { %v573_v40 = vmul.f32 %v1839_v35, %v1839_v35  ;;  %v575_v45 = vmul.f32 %v1842_v36, %v1842_v36  ;;  %v1855_v46 = vadd.f32 %v505_v42, %v1830_v29  ;;  %v1858_v49 = vadd.f32 %v558_v44, %v1832_v30  ;;  %v507_v47 = vpop.f32.mrb[3].mxu1  ;;  %v560_v50 = vpop.f32.mrb[7].mxu0 }
 0x30f   :  { %v574_v51 = vmul.f32 %v1845_v39, %v1845_v39  ;;  %v576_v52 = vmul.f32 %v1848_v41, %v1848_v41  ;;  %v1865_v43 = vadd.f32 %v507_v47, %v1834_v31  ;;  %v1868_v48 = vadd.f32 %v560_v50, %v1836_v32 }
 0x310   :  { %v589_v54 = vmul.f32 %v573_v40, %v1839_v35  ;;  %v591_v55 = vmul.f32 %v575_v45, %v1842_v36  ;;  %v577_v58 = vmul.f32 %v1855_v46, %v1855_v46  ;;  %v579_v59 = vmul.f32 %v1858_v49, %v1858_v49 }
 0x311   :  { %v590_v62 = vmul.f32 %v574_v51, %v1845_v39  ;;  %v592_v63 = vmul.f32 %v576_v52, %v1848_v41  ;;  %v578_v2 = vmul.f32 %v1865_v43, %v1865_v43  ;;  %v580_v3 = vmul.f32 %v1868_v48, %v1868_v48 }
 0x312   :  { %v605_v6 = vmul.f32 0.044715, %v589_v54  ;;  %v607_v7 = vmul.f32 0.044715, %v591_v55  ;;  %v593_v10 = vmul.f32 %v577_v58, %v1855_v46  ;;  %v595_v11 = vmul.f32 %v579_v59, %v1858_v49 }
 0x313   :  { %v606_v14 = vmul.f32 0.044715, %v590_v62  ;;  %v608_v15 = vmul.f32 0.044715, %v592_v63  ;;  %v594_v18 = vmul.f32 %v578_v2, %v1865_v43  ;;  %v596_v19 = vmul.f32 %v580_v3, %v1868_v48  ;;  %v511_v21 = vpop.f32.mrb[4].mxu1  ;;  %v564_v22 = vpop.f32.mrb[8].mxu0 }
 0x314   :  { %v621_v23 = vadd.f32 %v605_v6, %v1839_v35  ;;  %v623_v25 = vadd.f32 %v607_v7, %v1842_v36  ;;  %v609_v26 = vmul.f32 0.044715, %v593_v10  ;;  %v611_v33 = vmul.f32 0.044715, %v595_v11  ;;  %v513_v34 = vpop.f32.mrb[5].mxu1  ;;  %v566_v37 = vpop.f32.mrb[9].mxu0 }
 0x315   :  { %v622_v38 = vadd.f32 %v606_v14, %v1845_v39  ;;  %v624_v42 = vadd.f32 %v608_v15, %v1848_v41  ;;  %v610_v44 = vmul.f32 0.044715, %v594_v18  ;;  %v612_v40 = vmul.f32 0.044715, %v596_v19  ;;  %v515_v45 = vpop.f32.mrb[6].mxu1  ;;  %v568_v47 = vpop.f32.mrb[10].mxu0 }
 0x316   :  { %v637_v50 = vmul.f32 0.7978846, %v621_v23  ;;  %v639_v51 = vmul.f32 0.7978846, %v623_v25  ;;  %v625_v52 = vadd.f32 %v609_v26, %v1855_v46  ;;  %v627_v54 = vadd.f32 %v611_v33, %v1858_v49  ;;  %v517_v55 = vpop.f32.mrb[7].mxu1  ;;  %v570_v58 = vpop.f32.mrb[11].mxu0 }
 0x317   :  { %v638_v59 = vmul.f32 0.7978846, %v622_v38  ;;  %v640_v62 = vmul.f32 0.7978846, %v624_v42  ;;  %v626_v63 = vadd.f32 %v610_v44, %v1865_v43  ;;  %v628_v2 = vadd.f32 %v612_v40, %v1868_v48 }
 0x318   :  { %1421 = vtanh.f32 %v637_v50  ;;  %v641_v3 = vmul.f32 0.7978846, %v625_v52  ;;  %v643_v6 = vmul.f32 0.7978846, %v627_v54  ;;  %v1895_v7 = vadd.f32 %v511_v21, %v1830_v29 }
 0x319   :  { %1423 = vtanh.f32 %v639_v51  ;;  %v642_v10 = vmul.f32 0.7978846, %v626_v63  ;;  %v644_v11 = vmul.f32 0.7978846, %v628_v2  ;;  %v1898_v14 = vadd.f32 %v564_v22, %v1832_v30 }
 0x31a   :  { %1425 = vtanh.f32 %v638_v59  ;;  %v581_v15 = vmul.f32 %v1895_v7, %v1895_v7  ;;  %v1903_v18 = vadd.f32 %v513_v34, %v1834_v31  ;;  %v1906_v19 = vadd.f32 %v566_v37, %v1836_v32 }
 0x31b   :  { %1427 = vtanh.f32 %v640_v62  ;;  %v583_v21 = vmul.f32 %v1898_v14, %v1898_v14  ;;  %v1911_v23 = vadd.f32 %v515_v45, %v1830_v29  ;;  %v1914_v22 = vadd.f32 %v568_v47, %v1832_v30 }
 0x31c   :  { %1429 = vtanh.f32 %v641_v3  ;;  %v597_v25 = vmul.f32 %v581_v15, %v1895_v7  ;;  %v582_v26 = vmul.f32 %v1903_v18, %v1903_v18  ;;  %v584_v33 = vmul.f32 %v1906_v19, %v1906_v19 }
 0x31d   :  { %1431 = vtanh.f32 %v643_v6  ;;  %v599_v34 = vmul.f32 %v583_v21, %v1898_v14  ;;  %v585_v37 = vmul.f32 %v1911_v23, %v1911_v23  ;;  %v587_v29 = vmul.f32 %v1914_v22, %v1914_v22 }
 0x31e   :  { %1433 = vtanh.f32 %v642_v10  ;;  %v613_v30 = vmul.f32 0.044715, %v597_v25  ;;  %v598_v38 = vmul.f32 %v582_v26, %v1903_v18  ;;  %v600_v42 = vmul.f32 %v584_v33, %v1906_v19 }
 0x31f   :  { %1435 = vtanh.f32 %v644_v11  ;;  %v615_v44 = vmul.f32 0.044715, %v599_v34  ;;  %v601_v40 = vmul.f32 %v585_v37, %v1911_v23  ;;  %v603_v45 = vmul.f32 %v587_v29, %v1914_v22 }
 0x320   :  { %v629_v47 = vadd.f32 %v613_v30, %v1895_v7  ;;  %v614_v50 = vmul.f32 0.044715, %v598_v38  ;;  %v616_v51 = vmul.f32 0.044715, %v600_v42  ;;  %v1932_v52 = vadd.f32 %v517_v55, %v1834_v31 }
 0x321   :  { %v631_v54 = vadd.f32 %v615_v44, %v1898_v14  ;;  %v617_v59 = vmul.f32 0.044715, %v601_v40  ;;  %v619_v62 = vmul.f32 0.044715, %v603_v45  ;;  %v1936_v63 = vadd.f32 %v570_v58, %v1836_v32 }
 0x322   :  { %v1422_v2 = vpop.eup %1421  ;;  %v645_v3 = vmul.f32 0.7978846, %v629_v47  ;;  %v630_v6 = vadd.f32 %v614_v50, %v1903_v18  ;;  %v632_v10 = vadd.f32 %v616_v51, %v1906_v19  ;;  %v586_v11 = vmul.f32 %v1932_v52, %v1932_v52 }
 0x323   :  { %v1424_v15 = vpop.eup %1423  ;;  %v669_v21 = vadd.f32 1.0, %v1422_v2  ;;  %v647_v31 = vmul.f32 0.7978846, %v631_v54  ;;  %v633_v55 = vadd.f32 %v617_v59, %v1911_v23  ;;  %v635_v25 = vadd.f32 %v619_v62, %v1914_v22 }
 0x324   :  { %v1426_v26 = vpop.eup %1425  ;;  %v671_v33 = vadd.f32 1.0, %v1424_v15  ;;  %1437 = vtanh.f32 %v645_v3  ;;  %v646_v32 = vmul.f32 0.7978846, %v630_v6  ;;  %v648_v58 = vmul.f32 0.7978846, %v632_v10 }
 0x325   :  { %v1428_v34 = vpop.eup %1427  ;;  %v685_v37 = vmul.f32 0.5, %v669_v21  ;;  %1439 = vtanh.f32 %v647_v31  ;;  %v649_v29 = vmul.f32 0.7978846, %v633_v55  ;;  %v651_v30 = vmul.f32 0.7978846, %v635_v25 }
 0x326   :  { %v1430_v38 = vpop.eup %1429  ;;  %v687_v42 = vmul.f32 0.5, %v671_v33  ;;  %1441 = vtanh.f32 %v646_v32  ;;  %v602_v44 = vmul.f32 %v586_v11, %v1932_v52  ;;  %v588_v40 = vmul.f32 %v1936_v63, %v1936_v63 }
 0x327   :  { %v1432_v45 = vpop.eup %1431  ;;  %v701_v47 = vmul.f32 %v685_v37, %v1839_v35  ;;  %v673_v50 = vadd.f32 1.0, %v1430_v38  ;;  %1443 = vtanh.f32 %v648_v58  ;;  %v670_v51 = vadd.f32 1.0, %v1426_v26 }
 0x328   :  { %v1434_v54 = vpop.eup %1433  ;;  %v703_v59 = vmul.f32 %v687_v42, %v1842_v36  ;;  %v675_v62 = vadd.f32 1.0, %v1432_v45  ;;  %1445 = vtanh.f32 %v649_v29  ;;  %v618_v2 = vmul.f32 0.044715, %v602_v44 }
 0x329   :  { %v1436_v3 = vpop.eup %1435  ;;  %v689_v6 = vmul.f32 0.5, %v673_v50  ;;  %1447 = vtanh.f32 %v651_v30  ;;  %v604_v10 = vmul.f32 %v588_v40, %v1936_v63  ;;  %v674_v11 = vadd.f32 1.0, %v1434_v54 }
 0x32a   :  { %v691_v15 = vmul.f32 0.5, %v675_v62  ;;  %v634_v21 = vadd.f32 %v618_v2, %v1932_v52  ;;  %v686_v31 = vmul.f32 0.5, %v670_v51  ;;  %v672_v35 = vadd.f32 1.0, %v1428_v34 }
 0x32b   :  { %v705_v55 = vmul.f32 %v689_v6, %v1855_v46  ;;  %v620_v25 = vmul.f32 0.044715, %v604_v10  ;;  %v690_v26 = vmul.f32 0.5, %v674_v11  ;;  %v676_v33 = vadd.f32 1.0, %v1436_v3 }
 0x32c   :  { %v707_v36 = vmul.f32 %v691_v15, %v1858_v49  ;;  %v650_v32 = vmul.f32 0.7978846, %v634_v21  ;;  %v702_v58 = vmul.f32 %v686_v31, %v1845_v39  ;;  %v688_v37 = vmul.f32 0.5, %v672_v35 }
 0x32d   :  { %v717_v29 = vpack.c.bf16 %v705_v55, %v701_v47  ;;  %v636_v30 = vadd.f32 %v620_v25, %v1936_v63  ;;  %v706_v38 = vmul.f32 %v690_v26, %v1865_v43  ;;  %v692_v42 = vmul.f32 0.5, %v676_v33 }
 0x32e   :  { %v1438_v44 = vpop.eup %1437  ;;  %v719_v40 = vpack.c.bf16 %v707_v36, %v703_v59  ;;  %1449 = vtanh.f32 %v650_v32  ;;  %v704_v46 = vmul.f32 %v688_v37, %v1848_v41 }
 0x32f   :  { %v1440_v34 = vpop.eup %1439  ;;  %v652_v45 = vmul.f32 0.7978846, %v636_v30  ;;  %v718_v50 = vpack.c.bf16 %v706_v38, %v702_v58  ;;  %v708_v49 = vmul.f32 %v692_v42, %v1868_v48  ;;  %v677_v51 = vadd.f32 1.0, %v1438_v44 }
 0x330   :  { %v1442_v54 = vpop.eup %1441  ;;  %v679_v39 = vadd.f32 1.0, %v1440_v34 }
 0x331   :  { %v1444_v62 = vpop.eup %1443  ;;  %1451 = vtanh.f32 %v652_v45  ;;  %1020 = vmatprep.mubr.bf16.mxu1 %v718_v50  ;;  %v720_v47 = vpack.c.bf16 %v708_v49, %v704_v46  ;;  %v693_v41 = vmul.f32 0.5, %v677_v51  ;;  %v678_v48 = vadd.f32 1.0, %v1442_v54 }
 0x332   :  { %v1446_v2 = vpop.eup %1445  ;;  %1021 = vmatmul.mubr.bf16.vlgmr.msra.gmra.mrb[8].mxu1 %v717_v29  ;;  %v695_v3 = vmul.f32 0.5, %v679_v39  ;;  %v680_v55 = vadd.f32 1.0, %v1444_v62 }
 0x333   :  { %v1448_v43 = vpop.eup %1447  ;;  %1069 = vmatprep.mubr.bf16.mxu0 %v720_v47  ;;  %1314 = vmatpush3.bf16.msra.mxu1 %v1698_v53  ;;  %v681_v59 = vadd.f32 1.0, %v1446_v2  ;;  %v709_v15 = vmul.f32 %v693_v41, %v1895_v7  ;;  %v694_v26 = vmul.f32 0.5, %v678_v48 }
 0x334   :  { %v683_v6 = vadd.f32 1.0, %v1448_v43  ;;  %1070 = vmatmul.mubr.bf16.vlgmr.msra.gmra.mrb[12].mxu0 %v719_v40  ;;  %1307 = vmatprep.subr.bf16.mxu1 %v1710_v56  ;;  %v711_v35 = vmul.f32 %v695_v3, %v1898_v14  ;;  %v696_v7 = vmul.f32 0.5, %v680_v55 }
 0x335   :  { %v697_v10 = vmul.f32 0.5, %v681_v59 }
 0x336   :  { %v699_v11 = vmul.f32 0.5, %v683_v6 }
 0x337   :  { %1315 = vmatpush3.bf16.msra.mxu1 %v1716_v57  ;;  %v713_v21 = vmul.f32 %v697_v10, %v1911_v23  ;;  %v710_v23 = vmul.f32 %v694_v26, %v1903_v18 }
 0x338   :  { %v1450_v31 = vpop.eup %1449  ;;  %v715_v53 = vmul.f32 %v699_v11, %v1914_v22  ;;  %1308 = vmatprep.subr.bf16.mxu1 %v1728_v60  ;;  %v712_v60 = vmul.f32 %v696_v7, %v1906_v19 }
 0x339   :  { %v682_v25 = vadd.f32 1.0, %v1450_v31  ;;  %v721_v56 = vpack.c.bf16 %v713_v21, %v709_v15 }
 0x33a   :  { %v723_v33 = vpack.c.bf16 %v715_v53, %v711_v35 }
 0x33b   :  { %v1452_v36 = vpop.eup %1451  ;;  %v698_v32 = vmul.f32 0.5, %v682_v25  ;;  %1316 = vmatpush3.bf16.msra.mxu1 %v1733_v61 }
 0x33c   :  { %v684_v57 = vadd.f32 1.0, %v1452_v36  ;;  %1309 = vmatprep.subr.bf16.mxu1 %v1746_v0 }
 0x33d   :  { %v714_v14 = vmul.f32 %v698_v32, %v1932_v52 }
 0x33e   :  { %v700_v22 = vmul.f32 0.5, %v684_v57 }
 0x33f   :  { %v722_v58 = vpack.c.bf16 %v714_v14, %v710_v23  ;;  %1317 = vmatpush3.bf16.msra.mxu1 %v1751_v1  ;;  %v1159_v1 = vld [vmem:[%s2003_s9] ss:$0 sm:$0xff] }
 0x340   :  { %v716_v37 = vmul.f32 %v700_v22, %v1936_v63  ;;  %1310 = vmatprep.subr.bf16.mxu1 %v1764_v4 }
 0x341   :  { %1028 = vmatprep.mubr.bf16.mxu1 %v722_v58 }
 0x342   :  { %1029 = vmatmul.mubr.bf16.gmra.mrb[12].mxu1 %v721_v56  ;;  %v724_v61 = vpack.c.bf16 %v716_v37, %v712_v60 }
 0x343   :  { %1318 = vmatpush3.bf16.msra.mxu1 %v1769_v5 }
 0x344   :  { %1077 = vmatprep.mubr.bf16.mxu1 %v724_v61  ;;  %1311 = vmatprep.subr.bf16.mxu1 %v1782_v8 }
 0x347   :  { %1319 = vmatpush3.bf16.msra.mxu1 %v1787_v9 }
 0x348   :  { %1312 = vmatprep.subr.bf16.mxu1 %v1800_v12 }
 0x34b   :  { %1320 = vmatpush3.bf16.msra.mxu1 %v1805_v13 }
 0x34c   :  { %1313 = vmatprep.subr.bf16.mxu1 %v1818_v16 }
 0x34f   :  { %1321 = vmatpush3.bf16.msra.mxu1 %v1823_v17 }
 0x352   :  { %1078 = vmatmul.mubr.bf16.vlgmr.msra.gmra.mrb[16].mxu1 %v723_v33 }
 0x405   :  { %v1246_v0 = vpop.f32.mrb[8].mxu1 }
 0x406   :  { %v1247_v4 = vpop.f32.mrb[9].mxu1 }
 0x407   :  { %v1274_v5 = vpop.f32.mrb[12].mxu0  ;;  %v1248_v18 = vadd.f32 %v1247_v4, %v1246_v0  ;;  %v1249_v8 = vpop.f32.mrb[10].mxu1 }
 0x408   :  { %v1275_v19 = vpop.f32.mrb[13].mxu0  ;;  %v1250_v9 = vpop.f32.mrb[11].mxu1 }
 0x409   :  { %v1023_v52 = vadd.f32 %v1248_v18, %v1159_v1  ;;  %v1276_v12 = vadd.f32 %v1275_v19, %v1274_v5  ;;  %v1277_v63 = vpop.f32.mrb[14].mxu0  ;;  %v1251_v13 = vadd.f32 %v1250_v9, %v1249_v8 }
 0x40a   :  { %v1278_v29 = vpop.f32.mrb[15].mxu0 }
 0x40b   :  { %v1072_v16 = vadd.f32 %v1276_v12, %v1023_v52  ;;  %v1026_v30 = vadd.f32 %v1251_v13, %v1159_v1  ;;  %v1279_v17 = vadd.f32 %v1278_v29, %v1277_v63 }
 0x40d   :  { %v1075_v38 = vadd.f32 %v1279_v17, %v1026_v30  ;;  %v1086_v42 = vadd.f32 %v1072_v16, %v1550_v24 }
 0x40f   :  { %v1087_v44 = vadd.f32 %v1075_v38, %v1556_v28 }
 0x411   :  { %v1211_v40 = vpack.c.bf16 %v1087_v44, %v1086_v42 }
 0x413   :  { %1212 = vst [vmem:[%s2004_s10] sm:$0xff] %v1211_v40  }
 0x415   :  { %v1252_v46 = vpop.f32.mrb[12].mxu1 }
 0x416   :  { %v1253_v34 = vpop.f32.mrb[13].mxu1 }
 0x417   :  { %v1254_v45 = vadd.f32 %v1253_v34, %v1252_v46  ;;  %v1255_v50 = vpop.f32.mrb[14].mxu1 }
 0x418   :  { %v1256_v49 = vpop.f32.mrb[15].mxu1 }
 0x419   :  { %v1257_v51 = vadd.f32 %v1256_v49, %v1255_v50  ;;  %v1031_v62 = vadd.f32 %v1254_v45, %v1159_v1 }
 0x41b   :  { %v1034_v24 = vadd.f32 %v1257_v51, %v1159_v1 }
 0x425   :  { %v1280_v54 = vpop.f32.mrb[16].mxu1 }
 0x426   :  { %v1281_v39 = vpop.f32.mrb[17].mxu1 }
 0x427   :  { %v1282_v47 = vadd.f32 %v1281_v39, %v1280_v54  ;;  %v1283_v2 = vpop.f32.mrb[18].mxu1 }
 0x428   :  { %v1284_v43 = vpop.f32.mrb[19].mxu1 }
 0x429   :  { %v1080_v59 = vadd.f32 %v1282_v47, %v1031_v62  ;;  %v1285_v28 = vadd.f32 %v1284_v43, %v1283_v2 }
 0x42b   :  { %v1083_v41 = vadd.f32 %v1285_v28, %v1034_v24  ;;  %v1088_v3 = vadd.f32 %v1080_v59, %v1548_v20 }
 0x42d   :  { %v1089_v6 = vadd.f32 %v1083_v41, %v1554_v27 }
 0x42f   :  { %v1216_v48 = vpack.c.bf16 %v1089_v6, %v1088_v3 }
 0x431   :  { %1219 = vst [vmem:[%s2004_s10 + $0x8] sm:$0xff] %v1216_v48  }

</bundles_post_ra>
